<compile_context>
chip_gen: v7x
topology: tpu7x:2x2x1
jax: 0.10.0
libtpu: 0.0.40
codegen_flags: <defaults>
</compile_context>

<pallas_src>
import numpy as np

import jax
import jax.numpy as jnp
from jax.experimental import pallas as pl
from jax.experimental.pallas import tpu as pltpu

LANES = 128


def _round_up(x, m):
    return (x + m - 1) // m * m


# ---------------------------------------------------------------------------
# One-time parameter transforms (constant folding, NOT per-forward work).
# ---------------------------------------------------------------------------
def build_banded_conv(w_hwio, scale, shift, w_in, k_pad):
    """Banded matmul weights for a 3x3 VALID conv in the (H, W*C) layout.

    w_hwio : (3, 3, Cin, Cout) f32 conv weight
    scale  : (Cout,) f32 -- folded into the weight (BN scale, or ones)
    shift  : (Cout,) f32 -- additive term (BN shift, or conv bias)
    w_in   : input spatial width
    k_pad  : lane width of the layer input rows (>= w_in * Cin)

    Returns (wband bf16 (3, k_pad, n_pad), shift_row f32 (1, n_pad), w_out, n_pad)
    with out(y, x*Cout + co) = sum_dy  in_row(y+dy, :) @ wband[dy] at column
    x*Cout + co.  Columns >= w_out*Cout and rows >= w_in*Cin are zero padding.
    """
    _, _, cin, cout = w_hwio.shape
    w_out = w_in - 2
    n = w_out * cout
    n_pad = _round_up(n, LANES)
    w_eff = (np.asarray(w_hwio, np.float32)
             * np.asarray(scale, np.float32).reshape(1, 1, 1, cout))
    wband = np.zeros((3, k_pad, n_pad), np.float32)
    for dy in range(3):
        for x in range(w_out):
            for dx in range(3):
                r0 = (x + dx) * cin
                c0 = x * cout
                wband[dy, r0:r0 + cin, c0:c0 + cout] += w_eff[dy, dx]
    shift_row = np.zeros((1, n_pad), np.float32)
    shift_row[0, :n] = np.tile(np.asarray(shift, np.float32), w_out)
    return (jnp.asarray(wband, dtype=jnp.bfloat16),
            jnp.asarray(shift_row, dtype=jnp.float32), w_out, n_pad)


def build_fc_head(w_fc, b_fc, h_out, w_out, k_pad):
    """mean(H*W) + Linear  ==  row-sum( h_last @ w_rep ) + b, 1/S folded in."""
    c, nclass = w_fc.shape
    n_pad = _round_up(max(nclass, 1), LANES)
    inv_s = 1.0 / float(h_out * w_out)
    wf = np.asarray(w_fc, np.float32) * inv_s
    w_rep = np.zeros((k_pad, n_pad), np.float32)
    for x in range(w_out):
        w_rep[x * c:(x + 1) * c, :nclass] = wf
    b_pad = np.zeros((1, n_pad), np.float32)
    b_pad[0, :nclass] = np.asarray(b_fc, np.float32)
    return jnp.asarray(w_rep, dtype=jnp.bfloat16), jnp.asarray(b_pad, dtype=jnp.float32)


def build_convnet_params(conv_layers, w_fc, b_fc, h_in, w_in):
    """conv_layers: list of (w_hwio f32, scale (Cout,) f32, shift (Cout,) f32)."""
    banded, shifts = [], []
    k_pad = w_in * conv_layers[0][0].shape[2]      # first layer: Cin == 1 -> W
    cur_w = w_in
    for (w_hwio, scale, shift) in conv_layers:
        wb, sr, cur_w, n_pad = build_banded_conv(w_hwio, scale, shift, cur_w, k_pad)
        banded.append(wb)
        shifts.append(sr)
        k_pad = n_pad
    h_out = h_in - 2 * len(conv_layers)
    w_rep, b_pad = build_fc_head(w_fc, b_fc, h_out, cur_w, k_pad)
    return dict(banded=banded, shifts=shifts, w_rep=w_rep, b_pad=b_pad,
                nclass=w_fc.shape[1], h_in=h_in, w_in=w_in)


# ---------------------------------------------------------------------------
# Fused kernel: all conv layers + mean + FC per grid step (one image per step).
# ---------------------------------------------------------------------------
def make_convnet_kernel(nlayer):
    def kernel(*refs):
        # refs = (x, w1, s1, ..., wN, sN, wfc, bfc, out, scratch1, ..., scratchN)
        x_ref = refs[0]
        w_fc_ref = refs[1 + 2 * nlayer]
        b_fc_ref = refs[2 + 2 * nlayer]
        o_ref = refs[2 * nlayer + 3]
        scratch = refs[2 * nlayer + 4:]

        h_cur = x_ref.shape[1]          # input image height
        src = None                      # previous layer's VMEM scratch ref
        for l in range(nlayer):
            w_ref = refs[1 + 2 * l]     # (3, K, N) bf16 banded weights (resident)
            s_ref = refs[2 + 2 * l]     # (1, N) f32 shift, lane-replicated
            h_out = h_cur - 2

            def tap(dy, _l=l, _h=h_out, _src=src, _w=w_ref):
                if _l == 0:
                    lhs = x_ref[0, dy:dy + _h, :]      # (h_out, W) f32
                else:
                    lhs = _src[dy:dy + _h, :]          # (h_out, K) f32
                return jnp.dot(lhs.astype(jnp.bfloat16), _w[dy],
                               preferred_element_type=jnp.float32)

            acc = tap(0) + tap(1) + tap(2)             # MXU, f32 accumulate
            scratch[l][...] = jnp.maximum(acc + s_ref[...], 0.0)   # f32 VPU epilogue
            src = scratch[l]
            h_cur = h_out

        # Head: mean over spatial + Linear (dropout = identity in eval mode).
        v = jnp.dot(src[...].astype(jnp.bfloat16), w_fc_ref[...],
                    preferred_element_type=jnp.float32)            # (H_last, 128)
        logits = jnp.sum(v, axis=0, keepdims=True) + b_fc_ref[...]  # (1, 128)
        _, rows, lanes = o_ref.shape
        o_ref[0] = jnp.broadcast_to(logits, (rows, lanes))          # lane-dense store
    return kernel


def convnet_forward(x_nchw, params):
    B = x_nchw.shape[0]
    h_in, w_in = params["h_in"], params["w_in"]
    nlayer = len(params["banded"])
    nclass = params["nclass"]
    out_rows = 8                                   # f32 sublane tile for the store

    x2d = x_nchw[:, 0, :, :].astype(jnp.float32)   # (B, H, W); first conv Cin == 1

    operands = [x2d]
    in_specs = [pl.BlockSpec((1, h_in, w_in), lambda b: (b, 0, 0))]
    for wb, sr in zip(params["banded"], params["shifts"]):
        operands += [wb, sr]
        in_specs += [pl.BlockSpec(wb.shape, lambda b: (0, 0, 0)),   # VMEM-resident
                     pl.BlockSpec(sr.shape, lambda b: (0, 0))]
    operands += [params["w_rep"], params["b_pad"]]
    in_specs += [pl.BlockSpec(params["w_rep"].shape, lambda b: (0, 0)),
                 pl.BlockSpec(params["b_pad"].shape, lambda b: (0, 0))]
    n_out = params["b_pad"].shape[1]

    # Per-image VMEM scratch for layer activations (f32, channel-minor layout).
    scratch_shapes = []
    h_cur = h_in
    for wb in params["banded"]:
        h_cur -= 2
        scratch_shapes.append(pltpu.VMEM((h_cur, int(wb.shape[2])), jnp.float32))

    flops = 0
    hh = h_in
    for wb in params["banded"]:
        hh -= 2
        flops += 3 * 2 * hh * int(wb.shape[1]) * int(wb.shape[2])
    flops += 2 * hh * int(params["w_rep"].shape[0]) * int(params["w_rep"].shape[1])
    flops *= B
    bytes_accessed = sum(int(a.size) * a.dtype.itemsize for a in operands)
    bytes_accessed += B * out_rows * n_out * 4

    out = pl.pallas_call(
        make_convnet_kernel(nlayer),
        out_shape=jax.ShapeDtypeStruct((B, out_rows, n_out), jnp.float32),
        grid=(B,),                                  # >= 2 steps at the demo batch
        in_specs=in_specs,
        out_specs=pl.BlockSpec((1, out_rows, n_out), lambda b: (b, 0, 0)),
        scratch_shapes=scratch_shapes,
        compiler_params=pltpu.CompilerParams(
            dimension_semantics=("parallel",)),     # v7x megacore splits the batch
        cost_estimate=pl.CostEstimate(flops=flops, transcendentals=0,
                                      bytes_accessed=bytes_accessed),
    )(*operands)

    # Rows of each (8, 128) block are identical; keep row 0 and the real classes.
    return out[:, 0, :nclass]


if __name__ == "__main__":
    # Config consistent with the module: nchannel=8, nlayer=3, nclass=8, dropout=0.25
    nchannel, nlayer, nclass = 8, 3, 8
    B, H, W = 2, 16, 16
    chans = [1] + [nchannel * (2 ** i) for i in range(nlayer)]   # [1, 8, 16, 32]

    key = jax.random.PRNGKey(0)
    ki = iter(jax.random.split(key, 32))

    x = jax.random.normal(next(ki), (B, 1, H, W), dtype=jnp.float32)

    conv_layers = []        # per layer: (w_hwio f32, scale f32, shift f32)
    for li in range(nlayer):
        cin_l, cout_l = chans[li], chans[li + 1]
        w_hwio = jax.random.normal(next(ki), (3, 3, cin_l, cout_l), jnp.float32)
        w_hwio = w_hwio / jnp.sqrt(9.0 * cin_l)
        if li == 0:                                   # conv + bias, no BN
            bias = jax.random.normal(next(ki), (cout_l,), jnp.float32) * 0.1
            scale = jnp.ones((cout_l,), jnp.float32)
            shift = bias
        else:                                         # conv (no bias) + eval-mode BN
            gamma = 0.5 + jax.random.uniform(next(ki), (cout_l,), jnp.float32)
            beta = jax.random.normal(next(ki), (cout_l,), jnp.float32) * 0.1
            rmean = jax.random.normal(next(ki), (cout_l,), jnp.float32) * 0.1
            rvar = 0.5 + jax.random.uniform(next(ki), (cout_l,), jnp.float32)
            scale = gamma / jnp.sqrt(rvar + 1e-5)
            shift = beta - rmean * scale
        conv_layers.append((w_hwio, scale, shift))

    c_last = chans[-1]
    w_fc = jax.random.normal(next(ki), (c_last, nclass), jnp.float32) / jnp.sqrt(c_last)
    b_fc = jax.random.normal(next(ki), (nclass,), jnp.float32) * 0.1

    params = build_convnet_params(conv_layers, w_fc, b_fc, H, W)

    out = convnet_forward(x, params)
    out = jax.block_until_ready(out)
    assert out.shape == (B, nclass)

    # --- reference 1: dtype-matched pure-JAX emulation of the exact kernel math
    def ref_matched(x_nchw):
        h = x_nchw[:, 0, :, :].astype(jnp.float32)           # (B, H, W)
        for wb, sr in zip(params["banded"], params["shifts"]):
            ho = h.shape[1] - 2
            acc = jnp.einsum("byk,kn->byn", h[:, 0:ho, :].astype(jnp.bfloat16),
                             wb[0], preferred_element_type=jnp.float32)
            acc = acc + jnp.einsum("byk,kn->byn", h[:, 1:ho + 1, :].astype(jnp.bfloat16),
                                   wb[1], preferred_element_type=jnp.float32)
            acc = acc + jnp.einsum("byk,kn->byn", h[:, 2:ho + 2, :].astype(jnp.bfloat16),
                                   wb[2], preferred_element_type=jnp.float32)
            h = jnp.maximum(acc + sr, 0.0)
        v = jnp.einsum("byk,kn->byn", h.astype(jnp.bfloat16), params["w_rep"],
                       preferred_element_type=jnp.float32)
        return (v.sum(axis=1) + params["b_pad"])[:, :nclass]

    # --- reference 2: full f32 conv reference (PyTorch eval-mode semantics) ---
    def ref_f32(x_nchw):
        h = jnp.transpose(x_nchw, (0, 2, 3, 1))               # NHWC
        for (w_hwio, scale, shift) in conv_layers:
            h = jax.lax.conv_general_dilated(
                h, w_hwio, window_strides=(1, 1), padding="VALID",
                dimension_numbers=("NHWC", "HWIO", "NHWC"))
            h = jnp.maximum(h * scale.reshape(1, 1, 1, -1)
                            + shift.reshape(1, 1, 1, -1), 0.0)
        xm = h.mean(axis=(1, 2))                              # dropout = identity (eval)
        return xm @ w_fc + b_fc

    r1 = jax.block_until_ready(ref_matched(x))
    r2 = jax.block_until_ready(ref_f32(x))
    assert jnp.allclose(out, r1, atol=1e-2, rtol=1e-2)
    assert jnp.allclose(out, r2, atol=5e-2, rtol=5e-2)

    print("KERNEL_OK")
</pallas_src>

<mosaic_0001>
module attributes {stable_mosaic.version = 11 : i64} {
  func.func @kernel(%arg0: i32, %arg1: memref<1x16x16xf32, #tpu.memory_space<vmem>>, %arg2: memref<3x16x128xbf16, #tpu.memory_space<vmem>>, %arg3: memref<1x128xf32, #tpu.memory_space<vmem>>, %arg4: memref<3x128x256xbf16, #tpu.memory_space<vmem>>, %arg5: memref<1x256xf32, #tpu.memory_space<vmem>>, %arg6: memref<3x256x384xbf16, #tpu.memory_space<vmem>>, %arg7: memref<1x384xf32, #tpu.memory_space<vmem>>, %arg8: memref<384x128xbf16, #tpu.memory_space<vmem>>, %arg9: memref<1x128xf32, #tpu.memory_space<vmem>>, %arg10: memref<1x8x128xf32, #tpu.memory_space<vmem>>, %arg11: memref<14x128xf32, #tpu.memory_space<vmem>>, %arg12: memref<12x256xf32, #tpu.memory_space<vmem>>, %arg13: memref<10x384xf32, #tpu.memory_space<vmem>>) attributes {dimension_semantics = [#tpu.dimension_semantics<parallel>], iteration_bounds = array<i64: 2>, scalar_prefetch = 0 : i64, scratch_operands = 3 : i64, tpu.core_type = #tpu.core_type<tc>, window_params = [{transform_indices = @transform_0, window_bounds = array<i64: 1, 16, 16>}, {pipeline_mode = #tpu.pipeline_mode<synchronous>, transform_indices = @transform_1, window_bounds = array<i64: 3, 16, 128>}, {pipeline_mode = #tpu.pipeline_mode<synchronous>, transform_indices = @transform_2, window_bounds = array<i64: 1, 128>}, {pipeline_mode = #tpu.pipeline_mode<synchronous>, transform_indices = @transform_3, window_bounds = array<i64: 3, 128, 256>}, {pipeline_mode = #tpu.pipeline_mode<synchronous>, transform_indices = @transform_4, window_bounds = array<i64: 1, 256>}, {pipeline_mode = #tpu.pipeline_mode<synchronous>, transform_indices = @transform_5, window_bounds = array<i64: 3, 256, 384>}, {pipeline_mode = #tpu.pipeline_mode<synchronous>, transform_indices = @transform_6, window_bounds = array<i64: 1, 384>}, {pipeline_mode = #tpu.pipeline_mode<synchronous>, transform_indices = @transform_7, window_bounds = array<i64: 384, 128>}, {pipeline_mode = #tpu.pipeline_mode<synchronous>, transform_indices = @transform_8, window_bounds = array<i64: 1, 128>}, {transform_indices = @transform_9, window_bounds = array<i64: 1, 8, 128>}]} {
    %c0 = arith.constant 0 : index
    %c0_0 = arith.constant 0 : index
    %c0_1 = arith.constant 0 : index
    %0 = vector.load %arg1[%c0, %c0_0, %c0_1] : memref<1x16x16xf32, #tpu.memory_space<vmem>>, vector<1x14x16xf32>
    %1 = vector.shape_cast %0 : vector<1x14x16xf32> to vector<14x16xf32>
    %2 = arith.truncf %1 : vector<14x16xf32> to vector<14x16xbf16>
    %c0_2 = arith.constant 0 : index
    %c0_3 = arith.constant 0 : index
    %c0_4 = arith.constant 0 : index
    %3 = vector.load %arg2[%c0_2, %c0_3, %c0_4] : memref<3x16x128xbf16, #tpu.memory_space<vmem>>, vector<1x16x128xbf16>
    %4 = vector.shape_cast %3 : vector<1x16x128xbf16> to vector<16x128xbf16>
    %cst = arith.constant dense<0.000000e+00> : vector<14x128xf32>
    %5 = tpu.matmul %2, %4, %cst {dimension_numbers = #tpu.dot_dimension_numbers<[1], [0], [0], [1], [0, 0, 1, 1], [], []>} : vector<14x16xbf16>, vector<16x128xbf16>, vector<14x128xf32> -> vector<14x128xf32>
    %c0_5 = arith.constant 0 : index
    %c1 = arith.constant 1 : index
    %c0_6 = arith.constant 0 : index
    %6 = vector.load %arg1[%c0_5, %c1, %c0_6] : memref<1x16x16xf32, #tpu.memory_space<vmem>>, vector<1x14x16xf32>
    %7 = vector.shape_cast %6 : vector<1x14x16xf32> to vector<14x16xf32>
    %8 = arith.truncf %7 : vector<14x16xf32> to vector<14x16xbf16>
    %c1_7 = arith.constant 1 : index
    %c0_8 = arith.constant 0 : index
    %c0_9 = arith.constant 0 : index
    %9 = vector.load %arg2[%c1_7, %c0_8, %c0_9] : memref<3x16x128xbf16, #tpu.memory_space<vmem>>, vector<1x16x128xbf16>
    %10 = vector.shape_cast %9 : vector<1x16x128xbf16> to vector<16x128xbf16>
    %cst_10 = arith.constant dense<0.000000e+00> : vector<14x128xf32>
    %11 = tpu.matmul %8, %10, %cst_10 {dimension_numbers = #tpu.dot_dimension_numbers<[1], [0], [0], [1], [0, 0, 1, 1], [], []>} : vector<14x16xbf16>, vector<16x128xbf16>, vector<14x128xf32> -> vector<14x128xf32>
    %12 = arith.addf %5, %11 : vector<14x128xf32>
    %c0_11 = arith.constant 0 : index
    %c2 = arith.constant 2 : index
    %c0_12 = arith.constant 0 : index
    %13 = vector.load %arg1[%c0_11, %c2, %c0_12] : memref<1x16x16xf32, #tpu.memory_space<vmem>>, vector<1x14x16xf32>
    %14 = vector.shape_cast %13 : vector<1x14x16xf32> to vector<14x16xf32>
    %15 = arith.truncf %14 : vector<14x16xf32> to vector<14x16xbf16>
    %c2_13 = arith.constant 2 : index
    %c0_14 = arith.constant 0 : index
    %c0_15 = arith.constant 0 : index
    %16 = vector.load %arg2[%c2_13, %c0_14, %c0_15] : memref<3x16x128xbf16, #tpu.memory_space<vmem>>, vector<1x16x128xbf16>
    %17 = vector.shape_cast %16 : vector<1x16x128xbf16> to vector<16x128xbf16>
    %cst_16 = arith.constant dense<0.000000e+00> : vector<14x128xf32>
    %18 = tpu.matmul %15, %17, %cst_16 {dimension_numbers = #tpu.dot_dimension_numbers<[1], [0], [0], [1], [0, 0, 1, 1], [], []>} : vector<14x16xbf16>, vector<16x128xbf16>, vector<14x128xf32> -> vector<14x128xf32>
    %19 = arith.addf %12, %18 : vector<14x128xf32>
    %c0_17 = arith.constant 0 : index
    %c0_18 = arith.constant 0 : index
    %20 = vector.load %arg3[%c0_17, %c0_18] : memref<1x128xf32, #tpu.memory_space<vmem>>, vector<1x128xf32>
    %21 = vector.broadcast %20 : vector<1x128xf32> to vector<14x128xf32>
    %22 = arith.addf %19, %21 : vector<14x128xf32>
    %cst_19 = arith.constant 0.000000e+00 : f32
    %23 = vector.broadcast %cst_19 : f32 to vector<14x128xf32>
    %24 = arith.maximumf %22, %23 : vector<14x128xf32>
    %c0_20 = arith.constant 0 : index
    %c0_21 = arith.constant 0 : index
    %25 = vector.load %arg11[%c0_20, %c0_21] : memref<14x128xf32, #tpu.memory_space<vmem>>, vector<14x128xf32>
    tpu.vector_store %arg11[%c0_20, %c0_21], %24 {strides = array<i32>} : memref<14x128xf32, #tpu.memory_space<vmem>>, vector<14x128xf32>,
    %c0_22 = arith.constant 0 : index
    %c0_23 = arith.constant 0 : index
    %26 = vector.load %arg11[%c0_22, %c0_23] : memref<14x128xf32, #tpu.memory_space<vmem>>, vector<12x128xf32>
    %27 = arith.truncf %26 : vector<12x128xf32> to vector<12x128xbf16>
    %c0_24 = arith.constant 0 : index
    %c0_25 = arith.constant 0 : index
    %c0_26 = arith.constant 0 : index
    %28 = vector.load %arg4[%c0_24, %c0_25, %c0_26] : memref<3x128x256xbf16, #tpu.memory_space<vmem>>, vector<1x128x256xbf16>
    %29 = vector.shape_cast %28 : vector<1x128x256xbf16> to vector<128x256xbf16>
    %cst_27 = arith.constant dense<0.000000e+00> : vector<12x256xf32>
    %30 = tpu.matmul %27, %29, %cst_27 {dimension_numbers = #tpu.dot_dimension_numbers<[1], [0], [0], [1], [0, 0, 1, 1], [], []>} : vector<12x128xbf16>, vector<128x256xbf16>, vector<12x256xf32> -> vector<12x256xf32>
    %c1_28 = arith.constant 1 : index
    %c0_29 = arith.constant 0 : index
    %31 = vector.load %arg11[%c1_28, %c0_29] : memref<14x128xf32, #tpu.memory_space<vmem>>, vector<12x128xf32>
    %32 = arith.truncf %31 : vector<12x128xf32> to vector<12x128xbf16>
    %c1_30 = arith.constant 1 : index
    %c0_31 = arith.constant 0 : index
    %c0_32 = arith.constant 0 : index
    %33 = vector.load %arg4[%c1_30, %c0_31, %c0_32] : memref<3x128x256xbf16, #tpu.memory_space<vmem>>, vector<1x128x256xbf16>
    %34 = vector.shape_cast %33 : vector<1x128x256xbf16> to vector<128x256xbf16>
    %cst_33 = arith.constant dense<0.000000e+00> : vector<12x256xf32>
    %35 = tpu.matmul %32, %34, %cst_33 {dimension_numbers = #tpu.dot_dimension_numbers<[1], [0], [0], [1], [0, 0, 1, 1], [], []>} : vector<12x128xbf16>, vector<128x256xbf16>, vector<12x256xf32> -> vector<12x256xf32>
    %36 = arith.addf %30, %35 : vector<12x256xf32>
    %c2_34 = arith.constant 2 : index
    %c0_35 = arith.constant 0 : index
    %37 = vector.load %arg11[%c2_34, %c0_35] : memref<14x128xf32, #tpu.memory_space<vmem>>, vector<12x128xf32>
    %38 = arith.truncf %37 : vector<12x128xf32> to vector<12x128xbf16>
    %c2_36 = arith.constant 2 : index
    %c0_37 = arith.constant 0 : index
    %c0_38 = arith.constant 0 : index
    %39 = vector.load %arg4[%c2_36, %c0_37, %c0_38] : memref<3x128x256xbf16, #tpu.memory_space<vmem>>, vector<1x128x256xbf16>
    %40 = vector.shape_cast %39 : vector<1x128x256xbf16> to vector<128x256xbf16>
    %cst_39 = arith.constant dense<0.000000e+00> : vector<12x256xf32>
    %41 = tpu.matmul %38, %40, %cst_39 {dimension_numbers = #tpu.dot_dimension_numbers<[1], [0], [0], [1], [0, 0, 1, 1], [], []>} : vector<12x128xbf16>, vector<128x256xbf16>, vector<12x256xf32> -> vector<12x256xf32>
    %42 = arith.addf %36, %41 : vector<12x256xf32>
    %c0_40 = arith.constant 0 : index
    %c0_41 = arith.constant 0 : index
    %43 = vector.load %arg5[%c0_40, %c0_41] : memref<1x256xf32, #tpu.memory_space<vmem>>, vector<1x256xf32>
    %44 = vector.broadcast %43 : vector<1x256xf32> to vector<12x256xf32>
    %45 = arith.addf %42, %44 : vector<12x256xf32>
    %cst_42 = arith.constant 0.000000e+00 : f32
    %46 = vector.broadcast %cst_42 : f32 to vector<12x256xf32>
    %47 = arith.maximumf %45, %46 : vector<12x256xf32>
    %c0_43 = arith.constant 0 : index
    %c0_44 = arith.constant 0 : index
    %48 = vector.load %arg12[%c0_43, %c0_44] : memref<12x256xf32, #tpu.memory_space<vmem>>, vector<12x256xf32>
    tpu.vector_store %arg12[%c0_43, %c0_44], %47 {strides = array<i32>} : memref<12x256xf32, #tpu.memory_space<vmem>>, vector<12x256xf32>,
    %c0_45 = arith.constant 0 : index
    %c0_46 = arith.constant 0 : index
    %49 = vector.load %arg12[%c0_45, %c0_46] : memref<12x256xf32, #tpu.memory_space<vmem>>, vector<10x256xf32>
    %50 = arith.truncf %49 : vector<10x256xf32> to vector<10x256xbf16>
    %c0_47 = arith.constant 0 : index
    %c0_48 = arith.constant 0 : index
    %c0_49 = arith.constant 0 : index
    %51 = vector.load %arg6[%c0_47, %c0_48, %c0_49] : memref<3x256x384xbf16, #tpu.memory_space<vmem>>, vector<1x256x384xbf16>
    %52 = vector.shape_cast %51 : vector<1x256x384xbf16> to vector<256x384xbf16>
    %cst_50 = arith.constant dense<0.000000e+00> : vector<10x384xf32>
    %53 = tpu.matmul %50, %52, %cst_50 {dimension_numbers = #tpu.dot_dimension_numbers<[1], [0], [0], [1], [0, 0, 1, 1], [], []>} : vector<10x256xbf16>, vector<256x384xbf16>, vector<10x384xf32> -> vector<10x384xf32>
    %c1_51 = arith.constant 1 : index
    %c0_52 = arith.constant 0 : index
    %54 = vector.load %arg12[%c1_51, %c0_52] : memref<12x256xf32, #tpu.memory_space<vmem>>, vector<10x256xf32>
    %55 = arith.truncf %54 : vector<10x256xf32> to vector<10x256xbf16>
    %c1_53 = arith.constant 1 : index
    %c0_54 = arith.constant 0 : index
    %c0_55 = arith.constant 0 : index
    %56 = vector.load %arg6[%c1_53, %c0_54, %c0_55] : memref<3x256x384xbf16, #tpu.memory_space<vmem>>, vector<1x256x384xbf16>
    %57 = vector.shape_cast %56 : vector<1x256x384xbf16> to vector<256x384xbf16>
    %cst_56 = arith.constant dense<0.000000e+00> : vector<10x384xf32>
    %58 = tpu.matmul %55, %57, %cst_56 {dimension_numbers = #tpu.dot_dimension_numbers<[1], [0], [0], [1], [0, 0, 1, 1], [], []>} : vector<10x256xbf16>, vector<256x384xbf16>, vector<10x384xf32> -> vector<10x384xf32>
    %59 = arith.addf %53, %58 : vector<10x384xf32>
    %c2_57 = arith.constant 2 : index
    %c0_58 = arith.constant 0 : index
    %60 = vector.load %arg12[%c2_57, %c0_58] : memref<12x256xf32, #tpu.memory_space<vmem>>, vector<10x256xf32>
    %61 = arith.truncf %60 : vector<10x256xf32> to vector<10x256xbf16>
    %c2_59 = arith.constant 2 : index
    %c0_60 = arith.constant 0 : index
    %c0_61 = arith.constant 0 : index
    %62 = vector.load %arg6[%c2_59, %c0_60, %c0_61] : memref<3x256x384xbf16, #tpu.memory_space<vmem>>, vector<1x256x384xbf16>
    %63 = vector.shape_cast %62 : vector<1x256x384xbf16> to vector<256x384xbf16>
    %cst_62 = arith.constant dense<0.000000e+00> : vector<10x384xf32>
    %64 = tpu.matmul %61, %63, %cst_62 {dimension_numbers = #tpu.dot_dimension_numbers<[1], [0], [0], [1], [0, 0, 1, 1], [], []>} : vector<10x256xbf16>, vector<256x384xbf16>, vector<10x384xf32> -> vector<10x384xf32>
    %65 = arith.addf %59, %64 : vector<10x384xf32>
    %c0_63 = arith.constant 0 : index
    %c0_64 = arith.constant 0 : index
    %66 = vector.load %arg7[%c0_63, %c0_64] : memref<1x384xf32, #tpu.memory_space<vmem>>, vector<1x384xf32>
    %67 = vector.broadcast %66 : vector<1x384xf32> to vector<10x384xf32>
    %68 = arith.addf %65, %67 : vector<10x384xf32>
    %cst_65 = arith.constant 0.000000e+00 : f32
    %69 = vector.broadcast %cst_65 : f32 to vector<10x384xf32>
    %70 = arith.maximumf %68, %69 : vector<10x384xf32>
    %c0_66 = arith.constant 0 : index
    %c0_67 = arith.constant 0 : index
    %71 = vector.load %arg13[%c0_66, %c0_67] : memref<10x384xf32, #tpu.memory_space<vmem>>, vector<10x384xf32>
    tpu.vector_store %arg13[%c0_66, %c0_67], %70 {strides = array<i32>} : memref<10x384xf32, #tpu.memory_space<vmem>>, vector<10x384xf32>,
    %c0_68 = arith.constant 0 : index
    %c0_69 = arith.constant 0 : index
    %72 = vector.load %arg13[%c0_68, %c0_69] : memref<10x384xf32, #tpu.memory_space<vmem>>, vector<10x384xf32>
    %73 = arith.truncf %72 : vector<10x384xf32> to vector<10x384xbf16>
    %c0_70 = arith.constant 0 : index
    %c0_71 = arith.constant 0 : index
    %74 = vector.load %arg8[%c0_70, %c0_71] : memref<384x128xbf16, #tpu.memory_space<vmem>>, vector<384x128xbf16>
    %cst_72 = arith.constant dense<0.000000e+00> : vector<10x128xf32>
    %75 = tpu.matmul %73, %74, %cst_72 {dimension_numbers = #tpu.dot_dimension_numbers<[1], [0], [0], [1], [0, 0, 1, 1], [], []>} : vector<10x384xbf16>, vector<384x128xbf16>, vector<10x128xf32> -> vector<10x128xf32>
    %cst_73 = arith.constant dense<0.000000e+00> : vector<128xf32>
    %76 = vector.multi_reduction <add>, %75, %cst_73 [0] : vector<10x128xf32> to vector<128xf32>
    %77 = vector.shape_cast %76 : vector<128xf32> to vector<1x128xf32>
    %c0_74 = arith.constant 0 : index
    %c0_75 = arith.constant 0 : index
    %78 = vector.load %arg9[%c0_74, %c0_75] : memref<1x128xf32, #tpu.memory_space<vmem>>, vector<1x128xf32>
    %79 = arith.addf %77, %78 : vector<1x128xf32>
    %80 = vector.shape_cast %79 : vector<1x128xf32> to vector<1x128xf32>
    %81 = vector.broadcast %80 : vector<1x128xf32> to vector<8x128xf32>
    %c0_76 = arith.constant 0 : index
    %c0_77 = arith.constant 0 : index
    %c0_78 = arith.constant 0 : index
    %82 = vector.load %arg10[%c0_76, %c0_77, %c0_78] : memref<1x8x128xf32, #tpu.memory_space<vmem>>, vector<1x8x128xf32>
    %83 = vector.shape_cast %82 : vector<1x8x128xf32> to vector<8x128xf32>
    %84 = vector.shape_cast %81 : vector<8x128xf32> to vector<1x8x128xf32>
    tpu.vector_store %arg10[%c0_76, %c0_77, %c0_78], %84 {strides = array<i32>} : memref<1x8x128xf32, #tpu.memory_space<vmem>>, vector<1x8x128xf32>,
    return
  }
  func.func @transform_0(%arg0: i32) -> (i32, i32, i32) {
    %c0_i32 = arith.constant 0 : i32
    %c0_i32_0 = arith.constant 0 : i32
    %c0_i32_1 = arith.constant 0 : i32
    return %arg0, %c0_i32, %c0_i32_0 : i32, i32, i32
  }
  func.func @transform_1(%arg0: i32) -> (i32, i32, i32) {
    %c0_i32 = arith.constant 0 : i32
    %c0_i32_0 = arith.constant 0 : i32
    %c0_i32_1 = arith.constant 0 : i32
    %c0_i32_2 = arith.constant 0 : i32
    return %c0_i32, %c0_i32_0, %c0_i32_1 : i32, i32, i32
  }
  func.func @transform_2(%arg0: i32) -> (i32, i32) {
    %c0_i32 = arith.constant 0 : i32
    %c0_i32_0 = arith.constant 0 : i32
    %c0_i32_1 = arith.constant 0 : i32
    return %c0_i32, %c0_i32_0 : i32, i32
  }
  func.func @transform_3(%arg0: i32) -> (i32, i32, i32) {
    %c0_i32 = arith.constant 0 : i32
    %c0_i32_0 = arith.constant 0 : i32
    %c0_i32_1 = arith.constant 0 : i32
    %c0_i32_2 = arith.constant 0 : i32
    return %c0_i32, %c0_i32_0, %c0_i32_1 : i32, i32, i32
  }
  func.func @transform_4(%arg0: i32) -> (i32, i32) {
    %c0_i32 = arith.constant 0 : i32
    %c0_i32_0 = arith.constant 0 : i32
    %c0_i32_1 = arith.constant 0 : i32
    return %c0_i32, %c0_i32_0 : i32, i32
  }
  func.func @transform_5(%arg0: i32) -> (i32, i32, i32) {
    %c0_i32 = arith.constant 0 : i32
    %c0_i32_0 = arith.constant 0 : i32
    %c0_i32_1 = arith.constant 0 : i32
    %c0_i32_2 = arith.constant 0 : i32
    return %c0_i32, %c0_i32_0, %c0_i32_1 : i32, i32, i32
  }
  func.func @transform_6(%arg0: i32) -> (i32, i32) {
    %c0_i32 = arith.constant 0 : i32
    %c0_i32_0 = arith.constant 0 : i32
    %c0_i32_1 = arith.constant 0 : i32
    return %c0_i32, %c0_i32_0 : i32, i32
  }
  func.func @transform_7(%arg0: i32) -> (i32, i32) {
    %c0_i32 = arith.constant 0 : i32
    %c0_i32_0 = arith.constant 0 : i32
    %c0_i32_1 = arith.constant 0 : i32
    return %c0_i32, %c0_i32_0 : i32, i32
  }
  func.func @transform_8(%arg0: i32) -> (i32, i32) {
    %c0_i32 = arith.constant 0 : i32
    %c0_i32_0 = arith.constant 0 : i32
    %c0_i32_1 = arith.constant 0 : i32
    return %c0_i32, %c0_i32_0 : i32, i32
  }
  func.func @transform_9(%arg0: i32) -> (i32, i32, i32) {
    %c0_i32 = arith.constant 0 : i32
    %c0_i32_0 = arith.constant 0 : i32
    %c0_i32_1 = arith.constant 0 : i32
    return %arg0, %c0_i32, %c0_i32_0 : i32, i32, i32
  }
}

</mosaic_0001>

<bundles_post_ra>
// kernel: tpu_custom_call.1
= control target key start
LH: loop header
LB: loop body
LE: loop exit
PB: predicated region body
PF: predicated region fallthrough
CT: control target
= control target key end

     0   :  { %s4193_s0 = inlined_call_operand.hbm [shape: f32[2,16,16], index: 0, kind: input, shape index: {}]   ;;  %s4194_s1 = inlined_call_operand.hbm [shape: bf16[3,16,128], index: 1, kind: input, shape index: {}]   ;;  %s4195_s2 = inlined_call_operand.vmem [shape: f32[1,128], index: 2, kind: input, shape index: {}]   ;;  %s4196_s3 = inlined_call_operand.hbm [shape: bf16[3,128,256], index: 3, kind: input, shape index: {}]   ;;  %s4197_s4 = inlined_call_operand.vmem [shape: f32[1,256], index: 4, kind: input, shape index: {}]   ;;  %s4198_s5 = inlined_call_operand.hbm [shape: bf16[3,256,384], index: 5, kind: input, shape index: {}]   ;;  %s4199_s6 = inlined_call_operand.vmem [shape: f32[1,384], index: 6, kind: input, shape index: {}]   ;;  %s4200_s7 = inlined_call_operand.hbm [shape: bf16[384,128], index: 7, kind: input, shape index: {}]   ;;  %s4201_s8 = inlined_call_operand.vmem [shape: f32[1,128], index: 8, kind: input, shape index: {}]   ;;  %s4202_s9 = inlined_call_operand.hbm [shape: f32[2,8,128], index: 9, kind: output, shape index: {}]  }
   0x1   :  { %4210 = sst [smem:[#allocation21_spill]] %s4194_s1 }
   0x2   :  { %14 = vsyncpa [#allocation6], 0 }
   0x3   :  { %16 = vsyncpa [#allocation6 + $0x1], 0 }
   0x4   :  { %17 = vsyncpa [#allocation9], 0 }
   0x5   :  { %18 = vsyncpa [#allocation12], 0 }
   0x6   :  { %19 = vsyncpa [#allocation7], 0 }
   0x7   :  { %21 = vsyncpa [#allocation7 + $0x1], 0  ;;  %s3837_s30 = smov 0   ;;  %s3839_s10 = smov 0  }
   0x8   :  { %s3841_s11 = smov 0   ;;  %s3843_s12 = smov 0  }
   0x9 LB: > { %4211 = sst [smem:[#allocation19_spill]] %s3758_s30  ;;  %s3858_s13 = sadd.s32 4294967295, %s3770_s12   ;;  %s3770_s12 = sphi %s3843_s12, %s4237_s12   ;;  %s3766_s11 = sphi %s3841_s11, %s4236_s11   ;;  %s3762_s10 = sphi %s3839_s10, %s4235_s10   ;;  %s3758_s30 = sphi %s3837_s30, %s4234_s30  }
   0xa   : > { %s2765_s14 = sadd.s32 4294967294, %s3770_s12   ;;  %p47_p0 = scmp.ne.s32.totalorder %s3762_s10, %s3758_s30 }
   0xb   : > { %p4203_p1 = scmp.eq.s32.totalorder %s3858_s13, 0  ;;  %p245_p3 = scmp.eq.s32.totalorder %s2765_s14, 1 }
   0xc   : > { %p2766_p5 = scmp.ge.s32.totalorder %s3770_s12, 1  ;;  %p252_p7 = scmp.lt.s32.totalorder %s3770_s12, 3 }
   0xd   : > { %p3867_p4 = por %p4203_p1, %p47_p0  ;;  %p3872_p6 = por %p245_p3, %p47_p0 }
   0xe   : > { %p3877_p8 = pnand %p2766_p5, %p252_p7  ;;  %s3772_s18 = smov [#allocation8]  }
   0xf   : > { %s4212_s15 = scalar_select %p3867_p4, 1, 0 }
  0x10   : > { %s4213_s16 = scalar_select %p3872_p6, 1, 0 }
  0x11   : > { %s4215_s17 = scalar_select %p3877_p8, 1, 0 }
  0x12   : > { %4214 = sst [smem:[#allocation20_spill]] %s4213_s16  ;;  %s264_s19 = sshll.u32 %s3772_s18, 4  ;;  %s3881_s19 = int_to_ptr.vmem [resolvable:$true] %s264_s19 }
  0x13   : > { %p3187_p9 = pneg %p3877_p8  ;;  %s3773_s21 = smov [#allocation11]  }
  0x14   : > { %s296_s22 = sshll.u32 %s3773_s21, 4  ;;  %s4217_s1 = sld [smem:[#allocation21_spill]]  ;;  %s3892_s22 = int_to_ptr.vmem [resolvable:$true] %s296_s22 }
  0x15   : > { %p3888_p11 = pnand %p3187_p9, %p4203_p1 }
  0x17   : > { %p3902_p13 = pneg %p3888_p11 }
  0x1a   : > { %s3554_s25 = scalar_lea.hbm %s4217_s1, 384 }
  0x1b   : > { %p3555_p12 = scmp.ne.s32.totalorder %s4217_s1, %s3554_s25  ;;  %p3561_p5 = scmp.lt.u32.totalorder %s3554_s25, %s4217_s1 }
  0x1d   : > { %p3557_p0 = pnand %p3902_p13, %p3555_p12 }
  0x1f   : > { %p3558_p3 = pneg %p3557_p0 }
  0x21   : > { %p3563_p7 = pnand %p3561_p5, %p3558_p3 }
  0x23   : > { %3566 = shalt.err (!%p3563_p7)
}
  0x24   : > { %s3567_s18 = scalar_lea.vmem %s3881_s19, 384  ;;  %p3575_p2 = scmp.lt.s32.totalorder %s3881_s19, %s3881_s19 }
  0x25   : > { %p3568_p9 = scmp.ne.s32.totalorder %s3881_s19, %s3567_s18  ;;  %p3576_p6 = scmp.lt.s32.totalorder %s3567_s18, %s3567_s18 }
  0x27   : > { %p3570_p10 = pnand %p3568_p9, %p3902_p13  ;;  %p3577_p12 = por %p3576_p6, %p3575_p2 }
  0x29   : > { %p3571_p1 = pneg %p3570_p10 }
  0x2b   : > { %p3578_p0 = pnand %p3577_p12, %p3571_p1 }
  0x2d   : > { %3581 = shalt.err (!%p3578_p0)
}
  0x2e   : > { %s4206_s21 = smov 64   ;;  %s4207_s23 = smov 4  }
  0x2f   : > { %3190 = dma.hbm_to_vmem [thread:$0]  (!%p3888_p11), %s4217_s1, 384, %s3881_s19, [#allocation9], %s4206_s21, %s4206_s21, %s4207_s23  }
  0x30   : > { %s3582_s29 = scalar_lea.hbm %s4198_s5, 18432 }
  0x31   : > { %p3583_p1 = scmp.ne.s32.totalorder %s4198_s5, %s3582_s29  ;;  %p3589_p10 = scmp.lt.u32.totalorder %s3582_s29, %s4198_s5 }
  0x33   : > { %p3585_p2 = pnand %p3583_p1, %p3902_p13 }
  0x35   : > { %p3586_p6 = pneg %p3585_p2 }
  0x37   : > { %p3591_p3 = pnand %p3589_p10, %p3586_p6 }
  0x39   : > { %3594 = shalt.err (!%p3591_p3)
}
  0x3a   : > { %s3595_s19 = scalar_lea.vmem %s3892_s22, 18432  ;;  %p3603_p12 = scmp.lt.s32.totalorder %s3892_s22, %s3892_s22 }
  0x3b   : > { %p3596_p5 = scmp.ne.s32.totalorder %s3892_s22, %s3595_s19  ;;  %p3604_p0 = scmp.lt.s32.totalorder %s3595_s19, %s3595_s19 }
  0x3d   : > { %p3598_p7 = pnand %p3596_p5, %p3902_p13  ;;  %p3605_p1 = por %p3604_p0, %p3603_p12 }
  0x3f   : > { %p3599_p9 = pneg %p3598_p7 }
  0x41   : > { %p3606_p2 = pnand %p3605_p1, %p3599_p9 }
  0x43   : > { %3609 = shalt.err (!%p3606_p2)
}
  0x44   : > { %s3776_s24 = smov 192   ;;  %s3777_s30 = smov 12  }
  0x45   : > { %3196 = dma.hbm_to_vmem [thread:$0]  (!%p3888_p11), %s4198_s5, 18432, %s3892_s22, [#allocation12], %s3776_s24, %s3776_s24, %s3777_s30  }
  0x46   : > { %s3778_s26 = smov [#allocation10]   ;;  %s3610_s18 = scalar_lea.hbm %s4196_s3, 6144 }
  0x47   : > { %s280_s27 = sshll.u32 %s3778_s26, 4  ;;  %p3611_p6 = scmp.ne.s32.totalorder %s4196_s3, %s3610_s18  ;;  %s281_s27 = int_to_ptr.vmem [resolvable:$true] %s280_s27 }
  0x48   : > { %p3617_p5 = scmp.lt.u32.totalorder %s3610_s18, %s4196_s3 }
  0x49   : > { %p3613_p10 = pnand %p3611_p6, %p3902_p13 }
  0x4b   : > { %p3614_p3 = pneg %p3613_p10 }
  0x4d   : > { %p3619_p7 = pnand %p3617_p5, %p3614_p3 }
  0x4f   : > { %3622 = shalt.err (!%p3619_p7)
}
  0x50   : > { %s3623_s22 = scalar_lea.vmem %s281_s27, 6144  ;;  %p3631_p1 = scmp.lt.s32.totalorder %s281_s27, %s281_s27 }
  0x51   : > { %p3624_p9 = scmp.ne.s32.totalorder %s281_s27, %s3623_s22  ;;  %p3632_p2 = scmp.lt.s32.totalorder %s3623_s22, %s3623_s22 }
  0x53   : > { %p3626_p12 = pnand %p3624_p9, %p3902_p13  ;;  %p3633_p4 = por %p3632_p2, %p3631_p1 }
  0x55   : > { %p3627_p0 = pneg %p3626_p12 }
  0x57   : > { %p3634_p8 = pnand %p3633_p4, %p3627_p0 }
  0x59   : > { %3637 = shalt.err (!%p3634_p8)
}
  0x5a   : > { %s3779_s21 = smov 128   ;;  %s3780_s24 = smov 8  }
  0x5b   : > { %3193 = dma.hbm_to_vmem [thread:$0]  (!%p3888_p11), %s4196_s3, 6144, %s281_s27, [#allocation9], %s3779_s21, %s3779_s21, %s3780_s24  }
  0x5c   : > { %s3781_s30 = smov [#allocation13]   ;;  %s3638_s29 = scalar_lea.hbm %s4200_s7, 3072 }
  0x5d   : > { %s312_s16 = sshll.u32 %s3781_s30, 4  ;;  %p3639_p4 = scmp.ne.s32.totalorder %s4200_s7, %s3638_s29  ;;  %s313_s16 = int_to_ptr.vmem [resolvable:$true] %s312_s16 }
  0x5e   : > { %p3645_p10 = scmp.lt.u32.totalorder %s3638_s29, %s4200_s7 }
  0x5f   : > { %p3641_p8 = pnand %p3639_p4, %p3902_p13 }
  0x61   : > { %p3642_p6 = pneg %p3641_p8 }
  0x63   : > { %p3647_p3 = pnand %p3645_p10, %p3642_p6 }
  0x65   : > { %3650 = shalt.err (!%p3647_p3)
}
  0x66   : > { %s3651_s27 = scalar_lea.vmem %s313_s16, 3072  ;;  %p3659_p12 = scmp.lt.s32.totalorder %s313_s16, %s313_s16 }
  0x67   : > { %p3652_p5 = scmp.ne.s32.totalorder %s313_s16, %s3651_s27  ;;  %p3660_p0 = scmp.lt.s32.totalorder %s3651_s27, %s3651_s27 }
  0x69   : > { %p3654_p7 = pnand %p3652_p5, %p3902_p13  ;;  %p3661_p1 = por %p3660_p0, %p3659_p12 }
  0x6b   : > { %p3655_p9 = pneg %p3654_p7 }
  0x6d   : > { %p3662_p2 = pnand %p3661_p1, %p3655_p9 }
  0x6f   : > { %3665 = shalt.err (!%p3662_p2)
}
  0x70   : > { %s4219_s1 = smov 4   ;;  %s4220_s23 = smov 64  }
  0x71   : > { %3199 = dma.hbm_to_vmem [thread:$0]  (!%p3888_p11), %s4200_s7, 3072, %s313_s16, [#allocation12], %s4220_s23, %s4220_s23, %s4219_s1  }
  0x72   : > { %s3992_s28 = sadd.s32 1, %s3770_s12   ;;  %s34_s20 = sadd.s32 1, %s3766_s11 }
  0x73   : > { %s31_s26 = ssub.s32 %s3770_s12, %s3992_s28  ;;  %p41_p13 = scmp.ne.s32.totalorder %s3766_s11, %s3762_s10 }
  0x74   : > { %p32_p4 = scmp.eq.s32.totalorder %s31_s26, 0  ;;  %p42_p8 = scmp.eq.s32.totalorder %s3770_s12, 0 }
  0x75   : > { %p4221_p6 = scmp.eq.s32.totalorder %s3858_s13, 1  ;;  %p3212_p3 = scmp.lt.s32.totalorder %s3770_s12, 2 }
  0x76   : > { %s4008_s14 = scalar_select %p32_p4, %s3766_s11, %s34_s20  }
  0x77   : > { %p4002_p10 = por %p4221_p6, %p41_p13  ;;  %p43_p5 = por %p42_p8, %p41_p13 }
  0x78   : > { %s329_s18 = sand.u32 1, %s3766_s11   ;;  %s3009_s16 = sshll.u32 %s3770_s12, 8 }
  0x79   : > { %s2772_s19 = sshll.u32 %s329_s18, 4  ;;  %s4015_s1 = scalar_lea.hbm %s4193_s0, %s3009_s16 }
  0x7a   : > { %s333_s23 = scalar_lea.vmem [#allocation5], %s2772_s19  ;;  %p4019_p11 = pnand %p3212_p3, %p43_p5 }
  0x7b   : > { %s340_s30 = sshll.u32 %s333_s23, 4  ;;  %s4023_s20 = scalar_lea.sflag [#allocation6], %s329_s18  ;;  %s4017_s30 = int_to_ptr.vmem [resolvable:$true] %s340_s30 }
  0x7c   : > { %s3666_s26 = scalar_lea.hbm %s4015_s1, 256  ;;  %p3668_p9 = pneg %p4019_p11 }
  0x7d   : > { %p3667_p7 = scmp.ne.s32.totalorder %s4015_s1, %s3666_s26  ;;  %s3671_s22 = scalar_lea.hbm %s4193_s0, 512 }
  0x7e   : > { %p3672_p1 = scmp.lt.u32.totalorder %s4015_s1, %s4193_s0  ;;  %p3673_p2 = scmp.lt.u32.totalorder %s3671_s22, %s3666_s26 }
  0x7f   : > { %p3669_p12 = pnand %p3668_p9, %p3667_p7  ;;  %p3675_p4 = scmp.lt.u32.totalorder %s3666_s26, %s4015_s1 }
  0x80   : > { %p3674_p13 = por %p3673_p2, %p3672_p1 }
  0x81   : > { %p3670_p0 = pneg %p3669_p12 }
  0x82   : > { %p3676_p8 = por %p3675_p4, %p3674_p13 }
  0x84   : > { %p3677_p6 = pnand %p3676_p8, %p3670_p0 }
  0x86   : > { %3680 = shalt.err (!%p3677_p6)
}
  0x87   : > { %s3681_s18 = scalar_lea.vmem %s4017_s30, 256  ;;  %s3782_s19 = smov [#allocation5]  }
  0x88   : > { %p3682_p3 = scmp.ne.s32.totalorder %s4017_s30, %s3681_s18  ;;  %s3686_s16 = sshll.u32 %s3782_s19, 4  ;;  %s3687_s16 = int_to_ptr.vmem [resolvable:$false] %s3686_s16 }
  0x89   : > { %s3688_s27 = scalar_lea.vmem %s3687_s16, 512  ;;  %p3689_p12 = scmp.lt.s32.totalorder %s4017_s30, %s3687_s16 }
  0x8a   : > { %p3684_p5 = pnand %p3682_p3, %p3668_p9  ;;  %p3690_p1 = scmp.lt.s32.totalorder %s3688_s27, %s3681_s18 }
  0x8c   : > { %p3685_p7 = pneg %p3684_p5  ;;  %p3691_p2 = por %p3690_p1, %p3689_p12 }
  0x8e   : > { %p3692_p13 = pnand %p3691_p2, %p3685_p7 }
  0x90   : > { %3695 = shalt.err (!%p3692_p13)
}
  0x91   : > { %3203 = dma.hbm_to_vmem [thread:$0]  (!%p4019_p11), %s4015_s1, 256, %s4017_s30, %s4023_s20, %s3779_s21, %s3779_s21, %s3780_s24  }
  0x92   : > { %p4224_p9 = scmp.ne.s32.totalorder %s4215_s17, 0 }
  0x93   : > { %s4057_s26 = sand.u32 (!%p4224_p9), 1, %s3762_s10   ;;  %p4225_p0 = scmp.ne.s32.totalorder (!%p4224_p9), %s4212_s15, 0 }
  0x94   : > { %352 = sbr.rel (%p4224_p9) target bundleno = 1379 (0x563), region = 56  ;;  %s2776_s22 = sshll.u32 (!%p4224_p9), %s4057_s26, 4 }
  0x95   : > { %s355_s23 = scalar_lea.sflag (!%p4224_p9), [#allocation6], %s4057_s26  ;;  %s358_s18 = scalar_lea.vmem (!%p4224_p9), [#allocation5], %s2776_s22 }
  0x9b   : > { %3741 = dma.done.wait (%p4225_p0), %s355_s23, 256  }
  0x9c   : > { %3743 = vsyncadd (%p4225_p0), %s355_s23, 4294967040  ;;  %p4226_p4 = scmp.eq.s32.totalorder %s3858_s13, 0 }
  0x9e   : > { %3745 = dma.done.wait (%p4226_p4), [#allocation9], 6528   ;;  %p4227_p11 = pmov %p4226_p4 }
  0x9f   : > { %p4228_p8 = pmov %p4226_p4 }
  0xa0   : > { %3747 = vsyncadd (%p4227_p11), [#allocation9], 4294960768 }
  0xa1   : > { %3749 = dma.done.wait (%p4228_p8), [#allocation12], 21504   ;;  %p4229_p6 = pmov %p4226_p4 }
  0xa2   : > { %v3783_v0 = vmov 0.0   ;;  %vm3784_vm0 = vmmov 0   ;;  %v3263_v1 = vld [vmem:[#allocation8 + $0x8] sm:$0xff]   ;;  %v3264_v2 = vld [vmem:[#allocation8] sm:$0xff]   ;;  %vm427_vm1 = vcmask 130048   ;;  %v3265_v9 = vld [vmem:[#allocation8 + $0x10] sm:$0xff]  }
  0xa3   : > { %3751 = vsyncadd (%p4229_p6), [#allocation12], 4294945792  ;;  %3113 = vmatprep.subr.bf16.mxu0 %v3783_v0  ;;  %3119 = vmatprep.subr.bf16.mxu1 %v3783_v0  ;;  %v415_v3 = vld [vmem:[%s358_s18 + $0x1] sm:$0xff]  ;;  %v416_v4 = vld [vmem:[%s358_s18 + $0x9] sm:$0x3f]  ;;  %v3785_v28 = vmov 0  }
  0xa4   : > { %3115 = vmatprep.mubr.msk.bf16.mxu0 %vm3784_vm0, %v3783_v0  ;;  %3121 = vmatprep.mubr.msk.bf16.mxu1 %vm3784_vm0, %v3783_v0  ;;  %v410_v5 = vld [vmem:[%s358_s18] sm:$0xff]  ;;  %v417_v6 = vpack.c.bf16 %v416_v4, %v415_v3  ;;  %v411_v7 = vld [vmem:[%s358_s18 + $0x8] sm:$0x3f]  ;;  %vm2627_vm2 = vcmask 1041408   ;;  %s2781_s25 = sshll.u32 %s4057_s26, 3  ;;  %s3006_s16 = sshll.u32 %s3858_s13, 7 }
  0xa5   : > { %3114 = vmatpush3.bf16.msra.mxu0 %v3263_v1  ;;  %3120 = vmatpush3.bf16.msra.mxu1 %v3264_v2  ;;  %v412_v8 = vpack.c.bf16 %v411_v7, %v410_v5  ;;  %v522_v10 = vld [vmem:[%s358_s18 + $0x2] sm:$0xff]  ;;  %v523_v11 = vld [vmem:[%s358_s18 + $0xa] sm:$0x3f]  ;;  %v2788_v62 = vld [vmem:[%s4195_s2] ss:$0 sm:$0xff]  ;;  %s408_s27 = scalar_lea.vmem [#allocation14], %s2781_s25  ;;  %s4149_s15 = scalar_lea.hbm %s4202_s9, %s3006_s16 }
  0xa6   : > { %3125 = vmatprep.subr.bf16.mxu0 %v3783_v0  ;;  %v3266_v12 = vld [vmem:[#allocation10 + $0x80] ss:$8 sps:$4 sm:$0xff]   ;;  %v3268_v13 = vld [vmem:[#allocation10 + $0x84] ss:$8 sps:$4 sm:$0xff]   ;;  %v3269_v14 = vld [vmem:[#allocation10 + $0x90] ss:$8 sps:$4 sm:$0xff]   ;;  %v524_v16 = vpack.c.bf16 %v523_v11, %v522_v10 }
  0xa7   : > { %v3271_v15 = vld [vmem:[#allocation10 + $0x94] ss:$8 sps:$4 sm:$0xff]   ;;  %712 = vmatprep.subr.bf16.mxu1 %v3268_v13  ;;  %v3274_v17 = vld [vmem:[#allocation10 + $0xa4] ss:$8 sps:$4 sm:$0xff]   ;;  %v3272_v18 = vld [vmem:[#allocation10 + $0xa0] ss:$8 sps:$4 sm:$0xff]  }
  0xa8   : > { %3116 = vmatmul.mubr.msk.bf16.vlgmr.msra.gmra.mrb[0].mxu0 %vm427_vm1, %v417_v6  ;;  %3122 = vmatmul.mubr.msk.bf16.vlgmr.msra.gmra.mrb[0].mxu1 %vm427_vm1, %v412_v8  ;;  %v3275_v19 = vld [vmem:[#allocation10 + $0xb0] ss:$8 sps:$4 sm:$0xff]   ;;  %v3277_v20 = vld [vmem:[#allocation10 + $0xb4] ss:$8 sps:$4 sm:$0xff]   ;;  %v3280_v21 = vld [vmem:[#allocation10 + $0xc4] ss:$8 sps:$4 sm:$0xff]  }
  0xa9   : > { %3126 = vmatpush3.bf16.msra.mxu0 %v3265_v9  ;;  %3127 = vmatprep.mubr.msk.bf16.mxu0 %vm3784_vm0, %v3783_v0  ;;  %v3278_v22 = vld [vmem:[#allocation10 + $0xc0] ss:$8 sps:$4 sm:$0xff]   ;;  %v3283_v23 = vld [vmem:[#allocation10 + $0xd4] ss:$8 sps:$4 sm:$0xff]   ;;  %v3281_v24 = vld [vmem:[#allocation10 + $0xd0] ss:$8 sps:$4 sm:$0xff]  }
  0xaa   : > { %713 = vmatpush1.bf16.msra.mxu1 %v3266_v12  ;;  %v3284_v25 = vld [vmem:[#allocation10 + $0xe0] ss:$8 sps:$4 sm:$0xff]   ;;  %v3286_v26 = vld [vmem:[#allocation10 + $0xe4] ss:$8 sps:$4 sm:$0xff]   ;;  %v3289_v27 = vld [vmem:[#allocation10 + $0xf4] ss:$8 sps:$4 sm:$0xff]   ;;  %744 = vmatprep.mubr.bf16.mxu1 %v3785_v28 }
  0xab   : > { %714 = vmatprep.subr.bf16.mxu1 %v3271_v15  ;;  %v3287_v29 = vld [vmem:[#allocation10 + $0xf0] ss:$8 sps:$4 sm:$0xff]   ;;  %v3292_v30 = vld [vmem:[#allocation10 + $0x4] ss:$8 sps:$4 sm:$0xff]   ;;  %v3343_v33 = vld [vmem:[#allocation11 + $0x19c] ss:$12 sps:$4 sm:$0xff]  }
  0xac   : > { %v3338_v31 = vld [vmem:[#allocation11 + $0x180] ss:$12 sps:$4 sm:$0xff]   ;;  %v3340_v32 = vld [vmem:[#allocation11 + $0x184] ss:$12 sps:$4 sm:$0xff]   ;;  %v3347_v38 = vld [vmem:[#allocation11 + $0x1c8] ss:$12 sps:$4 sm:$0xff]  }
  0xad   : > { %1462 = vmatprep.subr.bf16.mxu0 %v3340_v32  ;;  %v3341_v34 = vld [vmem:[#allocation11 + $0x198] ss:$12 sps:$4 sm:$0xff]   ;;  %v3346_v35 = vld [vmem:[#allocation11 + $0x1b4] ss:$12 sps:$4 sm:$0xff]   ;;  %v3344_v36 = vld [vmem:[#allocation11 + $0x1b0] ss:$12 sps:$4 sm:$0xff]  }
  0xae   : > { %715 = vmatpush1.bf16.msra.mxu1 %v3269_v14  ;;  %v3349_v37 = vld [vmem:[#allocation11 + $0x1cc] ss:$12 sps:$4 sm:$0xff]   ;;  %v3352_v39 = vld [vmem:[#allocation11 + $0x1e4] ss:$12 sps:$4 sm:$0xff]   ;;  %v3355_v41 = vld [vmem:[#allocation11 + $0x1fc] ss:$12 sps:$4 sm:$0xff]  }
  0xaf   : > { %716 = vmatprep.subr.bf16.mxu1 %v3274_v17  ;;  %v3350_v40 = vld [vmem:[#allocation11 + $0x1e0] ss:$12 sps:$4 sm:$0xff]   ;;  %v3353_v42 = vld [vmem:[#allocation11 + $0x1f8] ss:$12 sps:$4 sm:$0xff]   ;;  %v3356_v44 = vld [vmem:[#allocation11 + $0x210] ss:$12 sps:$4 sm:$0xff]  }
  0xb0   : > { %3128 = vmatmul.mubr.msk.bf16.vlgmr.msra.gmra.mrb[4].mxu0 %vm427_vm1, %v524_v16  ;;  %v3358_v43 = vld [vmem:[#allocation11 + $0x214] ss:$12 sps:$4 sm:$0xff]   ;;  %v3363_v45 = vld [vmem:[#allocation11 + $0x22c] ss:$12 sps:$4 sm:$0xff]   ;;  %v3368_v47 = vld [vmem:[#allocation11 + $0x244] ss:$12 sps:$4 sm:$0xff]  }
  0xb1   : > { %1463 = vmatpush1.bf16.msra.mxu0 %v3338_v31  ;;  %v3361_v46 = vld [vmem:[#allocation11 + $0x228] ss:$12 sps:$4 sm:$0xff]   ;;  %v3366_v48 = vld [vmem:[#allocation11 + $0x240] ss:$12 sps:$4 sm:$0xff]   ;;  %v3371_v50 = vld [vmem:[#allocation11 + $0x258] ss:$12 sps:$4 sm:$0xff]  }
  0xb2   : > { %717 = vmatpush1.bf16.msra.mxu1 %v3272_v18  ;;  %1464 = vmatprep.subr.bf16.mxu0 %v3343_v33  ;;  %v3373_v49 = vld [vmem:[#allocation11 + $0x25c] ss:$12 sps:$4 sm:$0xff]   ;;  %v3293_v14 = vld [vmem:[#allocation10 + $0x10] ss:$8 sps:$4 sm:$0xff]   ;;  %v3298_v15 = vld [vmem:[#allocation10 + $0x24] ss:$8 sps:$4 sm:$0xff]  }
  0xb3   : > { %718 = vmatprep.subr.bf16.mxu1 %v3277_v20  ;;  %v3290_v9 = vld [vmem:[#allocation10] ss:$8 sps:$4 sm:$0xff]   ;;  %v3295_v13 = vld [vmem:[#allocation10 + $0x14] ss:$8 sps:$4 sm:$0xff]   ;;  %v3299_v18 = vld [vmem:[#allocation10 + $0x30] ss:$8 sps:$4 sm:$0xff]  }
  0xb4   : > { %v3296_v16 = vld [vmem:[#allocation10 + $0x20] ss:$8 sps:$4 sm:$0xff]   ;;  %v3301_v17 = vld [vmem:[#allocation10 + $0x34] ss:$8 sps:$4 sm:$0xff]   ;;  %v3317_v33 = vld [vmem:[#allocation10 + $0x110] ss:$8 sps:$4 sm:$0xff]  }
  0xb5   : > { %1465 = vmatpush1.bf16.msra.mxu0 %v3341_v34  ;;  %v3302_v20 = vld [vmem:[#allocation10 + $0x40] ss:$8 sps:$4 sm:$0xff]   ;;  %v3319_v32 = vld [vmem:[#allocation10 + $0x114] ss:$8 sps:$4 sm:$0xff]   ;;  %v3322_v34 = vld [vmem:[#allocation10 + $0x124] ss:$8 sps:$4 sm:$0xff]  }
  0xb6   : > { %719 = vmatpush1.bf16.msra.mxu1 %v3275_v19  ;;  %1466 = vmatprep.subr.bf16.mxu0 %v3346_v35  ;;  %v3304_v19 = vld [vmem:[#allocation10 + $0x44] ss:$8 sps:$4 sm:$0xff]   ;;  %v3320_v35 = vld [vmem:[#allocation10 + $0x120] ss:$8 sps:$4 sm:$0xff]   ;;  %s2657_s22 = sshll.u32 %s408_s27, 4  ;;  %s2644_s17 = scalar_lea.sflag [#allocation7], %s4057_s26  ;;  %s4151_s22 = int_to_ptr.vmem [resolvable:$true] %s2657_s22 }
  0xb7   : > { %720 = vmatprep.subr.bf16.mxu1 %v3280_v21  ;;  %v3307_v21 = vld [vmem:[#allocation10 + $0x54] ss:$8 sps:$4 sm:$0xff]   ;;  %s3696_s21 = scalar_lea.vmem %s4151_s22, 128  ;;  %s3786_s13 = smov [#allocation14]  }
  0xb8   : > { %p3697_p3 = scmp.ne.s32.totalorder %s4151_s22, %s3696_s21  ;;  %s3700_s24 = sshll.u32 %s3786_s13, 4  ;;  %s3701_s24 = int_to_ptr.vmem [resolvable:$false] %s3700_s24 }
  0xb9   : > { %1467 = vmatpush1.bf16.msra.mxu0 %v3344_v36  ;;  %v3325_v36 = vld [vmem:[#allocation10 + $0x134] ss:$8 sps:$4 sm:$0xff]   ;;  %s3702_s1 = scalar_lea.vmem %s3701_s24, 256  ;;  %p3703_p12 = scmp.lt.s32.totalorder %s4151_s22, %s3701_s24 }
  0xba   : > { %721 = vmatpush1.bf16.msra.mxu1 %v3278_v22  ;;  %1468 = vmatprep.subr.bf16.mxu0 %v3349_v37  ;;  %v3305_v22 = vld [vmem:[#allocation10 + $0x50] ss:$8 sps:$4 sm:$0xff]   ;;  %p3698_p5 = pnand %p3697_p3, %p4002_p10  ;;  %p3704_p1 = scmp.lt.s32.totalorder %s3702_s1, %s3696_s21 }
  0xbb   : > { %722 = vmatprep.subr.bf16.mxu1 %v3283_v23  ;;  %v3310_v23 = vld [vmem:[#allocation10 + $0x64] ss:$8 sps:$4 sm:$0xff]   ;;  %v3323_v37 = vld [vmem:[#allocation10 + $0x130] ss:$8 sps:$4 sm:$0xff]  }
  0xbc   : > { %p3699_p7 = pneg %p3698_p5  ;;  %p3705_p2 = por %p3704_p1, %p3703_p12 }
  0xbd   : > { %1469 = vmatpush1.bf16.msra.mxu0 %v3347_v38  ;;  %v3328_v38 = vld [vmem:[#allocation10 + $0x144] ss:$8 sps:$4 sm:$0xff]  }
  0xbe   : > { %723 = vmatpush1.bf16.msra.mxu1 %v3281_v24  ;;  %1470 = vmatprep.subr.bf16.mxu0 %v3352_v39  ;;  %v3308_v24 = vld [vmem:[#allocation10 + $0x60] ss:$8 sps:$4 sm:$0xff]   ;;  %p3706_p13 = pnand %p3705_p2, %p3699_p7 }
  0xbf   : > { %724 = vmatprep.subr.bf16.mxu1 %v3286_v26  ;;  %v3311_v26 = vld [vmem:[#allocation10 + $0x70] ss:$8 sps:$4 sm:$0xff]   ;;  %v3326_v39 = vld [vmem:[#allocation10 + $0x140] ss:$8 sps:$4 sm:$0xff]  }
  0xc1   : > { %1471 = vmatpush1.bf16.msra.mxu0 %v3350_v40  ;;  %v3331_v40 = vld [vmem:[#allocation10 + $0x154] ss:$8 sps:$4 sm:$0xff]  }
  0xc2   : > { %725 = vmatpush1.bf16.msra.mxu1 %v3284_v25  ;;  %1472 = vmatprep.subr.bf16.mxu0 %v3355_v41  ;;  %v3313_v25 = vld [vmem:[#allocation10 + $0x74] ss:$8 sps:$4 sm:$0xff]   ;;  %v3329_v41 = vld [vmem:[#allocation10 + $0x150] ss:$8 sps:$4 sm:$0xff]  }
  0xc3   : > { %726 = vmatprep.subr.bf16.mxu1 %v3289_v27  ;;  %v3316_v27 = vld [vmem:[#allocation10 + $0x104] ss:$8 sps:$4 sm:$0xff]  }
  0xc5   : > { %1473 = vmatpush1.bf16.msra.mxu0 %v3353_v42  ;;  %v3334_v42 = vld [vmem:[#allocation10 + $0x164] ss:$8 sps:$4 sm:$0xff]  }
  0xc6   : > { %727 = vmatpush1.bf16.msra.mxu1 %v3287_v29  ;;  %1474 = vmatprep.subr.bf16.mxu0 %v3358_v43  ;;  %v3337_v43 = vld [vmem:[#allocation10 + $0x174] ss:$8 sps:$4 sm:$0xff]  }
  0xc7   : > { %835 = vmatprep.subr.bf16.mxu1 %v3292_v30  ;;  %v3314_v30 = vld [vmem:[#allocation10 + $0x100] ss:$8 sps:$4 sm:$0xff]  }
  0xc9   : > { %1475 = vmatpush1.bf16.msra.mxu0 %v3356_v44  ;;  %v3335_v44 = vld [vmem:[#allocation10 + $0x170] ss:$8 sps:$4 sm:$0xff]  }
  0xca   : > { %1476 = vmatprep.subr.bf16.mxu0 %v3363_v45  ;;  %v3359_v45 = vld [vmem:[#allocation11 + $0xc8] ss:$12 sps:$4 sm:$0xff]  }
  0xcd   : > { %1477 = vmatpush1.bf16.msra.mxu0 %v3361_v46 }
  0xce   : > { %1478 = vmatprep.subr.bf16.mxu0 %v3368_v47 }
  0xd1   : > { %1479 = vmatpush1.bf16.msra.mxu0 %v3366_v48  ;;  %v3360_v48 = vld [vmem:[#allocation11 + $0x8] ss:$12 sps:$4 sm:$0xff]  }
  0xd2   : > { %1480 = vmatprep.subr.bf16.mxu0 %v3373_v49 }
  0xd5   : > { %1481 = vmatpush1.bf16.msra.mxu0 %v3371_v50  ;;  %v3364_v50 = vld [vmem:[#allocation11 + $0xe0] ss:$12 sps:$4 sm:$0xff]  }
 0x17b   : > { %v465_v51 = vpop.f32.mrb[0].mxu0  ;;  %v515_v52 = vpop.f32.mrb[0].mxu1 }
 0x17c   : > { %v3117_v53 = vpop.f32.mrb[1].mxu0  ;;  %v516_v54 = vadd.f32 %v515_v52, %v465_v51  ;;  %v3123_v55 = vpop.f32.mrb[1].mxu1  ;;  %v3365_v51 = vld [vmem:[#allocation11 + $0x20] ss:$12 sps:$4 sm:$0xff]   ;;  %v3369_v52 = vld [vmem:[#allocation11 + $0xf8] ss:$12 sps:$4 sm:$0xff]  }
 0x17d   : > { %v468_v56 = vpop.f32.mrb[2].mxu0  ;;  %v518_v57 = vpop.f32.mrb[2].mxu1  ;;  %v3370_v53 = vld [vmem:[#allocation11 + $0x38] ss:$12 sps:$4 sm:$0xff]   ;;  %v3375_v55 = vld [vmem:[#allocation11 + $0x50] ss:$12 sps:$4 sm:$0xff]  }
 0x17e   : > { %v3118_v58 = vpop.f32.mrb[3].mxu0  ;;  %v519_v59 = vadd.f32 %v518_v57, %v468_v56  ;;  %v3124_v60 = vpop.f32.mrb[3].mxu1  ;;  %v3378_v56 = vld [vmem:[#allocation11 + $0x274] ss:$12 sps:$4 sm:$0xff]   ;;  %v3376_v57 = vld [vmem:[#allocation11 + $0x270] ss:$12 sps:$4 sm:$0xff]  }
 0x17f   : > { %1482 = vmatprep.subr.bf16.mxu0 %v3378_v56  ;;  %v3379_v58 = vld [vmem:[#allocation11 + $0x128] ss:$12 sps:$4 sm:$0xff]   ;;  %v3383_v60 = vld [vmem:[#allocation11 + $0x28c] ss:$12 sps:$4 sm:$0xff]  }
 0x180   : > { %1483 = vmatpush1.bf16.msra.mxu0 %v3376_v57  ;;  %v3408_v57 = vld [vmem:[#allocation11 + $0x3f8] ss:$12 sps:$4 sm:$0xff]  }
 0x181   : > { %1484 = vmatprep.subr.bf16.mxu0 %v3383_v60 }
 0x183   : > { %v571_v61 = vpop.f32.mrb[4].mxu0 }
 0x184   : > { %v578_v63 = vadd.f32 %v571_v61, %v516_v54  ;;  %v3129_v1 = vpop.f32.mrb[5].mxu0  ;;  %v3374_v54 = vld [vmem:[#allocation11 + $0x110] ss:$12 sps:$4 sm:$0xff]   ;;  %v3381_v61 = vld [vmem:[#allocation11 + $0x288] ss:$12 sps:$4 sm:$0xff]  }
 0x185   : > { %v574_v2 = vpop.f32.mrb[6].mxu0  ;;  %1485 = vmatpush1.bf16.msra.mxu0 %v3381_v61  ;;  %v3388_v1 = vld [vmem:[#allocation11 + $0x2a4] ss:$12 sps:$4 sm:$0xff]   ;;  %v3410_v61 = vld [vmem:[#allocation11 + $0x260] ss:$12 sps:$4 sm:$0xff]  }
 0x186   : > { %v587_v3 = vadd.f32 %v2788_v62, %v578_v63  ;;  %v579_v4 = vadd.f32 %v574_v2, %v519_v59  ;;  %v3130_v5 = vpop.f32.mrb[7].mxu0  ;;  %v3380_v59 = vld [vmem:[#allocation11 + $0x68] ss:$12 sps:$4 sm:$0xff]   ;;  %v3385_v63 = vld [vmem:[#allocation11 + $0x80] ss:$12 sps:$4 sm:$0xff]   ;;  %1486 = vmatprep.subr.bf16.mxu0 %v3388_v1 }
 0x187   : > { %v3386_v2 = vld [vmem:[#allocation11 + $0x2a0] ss:$12 sps:$4 sm:$0xff]   ;;  %v3391_v5 = vld [vmem:[#allocation11 + $0x2b8] ss:$12 sps:$4 sm:$0xff]  }
 0x188   : > { %v589_v6 = vmax.f32 %v587_v3, 0.0  ;;  %v588_v7 = vadd.f32 %v2788_v62, %v579_v4  ;;  %v3384_v62 = vld [vmem:[#allocation11 + $0x140] ss:$12 sps:$4 sm:$0xff]   ;;  %v3389_v3 = vld [vmem:[#allocation11 + $0x158] ss:$12 sps:$4 sm:$0xff]  }
 0x189   : > { %v3390_v4 = vld [vmem:[#allocation11 + $0x98] ss:$12 sps:$4 sm:$0xff]   ;;  %1487 = vmatpush1.bf16.msra.mxu0 %v3386_v2  ;;  %v3411_v1 = vld [vmem:[#allocation11 + $0x1a0] ss:$12 sps:$4 sm:$0xff]  }
 0x18a   : > { %591 = vst [vmem:[#allocation2] sm:$0xff] %v589_v6  ;;  %v590_v8 = vmax.f32 %v588_v7, 0.0  ;;  %v3394_v7 = vld [vmem:[#allocation11 + $0x170] ss:$12 sps:$4 sm:$0xff]   ;;  %v3414_v2 = vld [vmem:[#allocation11 + $0x278] ss:$12 sps:$4 sm:$0xff]  }
 0x18c   : > { %592 = vst [vmem:[#allocation2 + $0x8] sm:$0x3f] %v590_v8  ;;  %v3398_v8 = vld [vmem:[#allocation11 + $0x2d4] ss:$12 sps:$4 sm:$0xff]  }
 0x193   : > { %v612_v10 = vld [vmem:[#allocation2 + $0x1] sm:$0xff]  ;;  %v613_v11 = vld [vmem:[#allocation2 + $0x9] sm:$0xf] }
 0x194   : > { %v614_v12 = vpack.c.bf16 %v613_v11, %v612_v10  ;;  %v594_v29 = vld [vmem:[#allocation2 + $0x8] sm:$0xf]  ;;  %v3399_v11 = vld [vmem:[#allocation11 + $0x3c8] ss:$12 sps:$4 sm:$0xff]  }
 0x195   : > { %v595_v31 = vpack.c.bf16 %v594_v29, %v589_v6  ;;  %v878_v46 = vld [vmem:[#allocation2 + $0x2] sm:$0xff]  ;;  %v879_v47 = vld [vmem:[#allocation2 + $0xa] sm:$0xf] }
 0x196   : > { %745 = vmatmul.mubr.bf16.vlgmr.msra.gmra.mrb[4].mxu1 %v614_v12  ;;  %v880_v49 = vpack.c.bf16 %v879_v47, %v878_v46  ;;  %v3393_v6 = vld [vmem:[#allocation11 + $0x2bc] ss:$12 sps:$4 sm:$0xff]   ;;  %v3403_v12 = vld [vmem:[#allocation11 + $0x2ec] ss:$12 sps:$4 sm:$0xff]  }
 0x197   : > { %836 = vmatpush1.bf16.msra.mxu1 %v3290_v9  ;;  %867 = vmatprep.mubr.bf16.mxu1 %v3785_v28  ;;  %v3395_v9 = vld [vmem:[#allocation11 + $0xb0] ss:$12 sps:$4 sm:$0xff]  }
 0x198   : > { %837 = vmatprep.subr.bf16.mxu1 %v3295_v13  ;;  %1488 = vmatprep.subr.bf16.mxu0 %v3393_v6  ;;  %v3396_v10 = vld [vmem:[#allocation11 + $0x2d0] ss:$12 sps:$4 sm:$0xff]   ;;  %v3401_v13 = vld [vmem:[#allocation11 + $0x2e8] ss:$12 sps:$4 sm:$0xff]  }
 0x199   : > { %1489 = vmatpush1.bf16.msra.mxu0 %v3391_v5  ;;  %v3415_v5 = vld [vmem:[#allocation11 + $0x1b8] ss:$12 sps:$4 sm:$0xff]   ;;  %v3418_v6 = vld [vmem:[#allocation11 + $0x290] ss:$12 sps:$4 sm:$0xff]  }
 0x19a   : > { %1490 = vmatprep.subr.bf16.mxu0 %v3398_v8  ;;  %v3420_v8 = vld [vmem:[#allocation11 + $0x440] ss:$12 sps:$4 sm:$0xff]  }
 0x19b   : > { %838 = vmatpush1.bf16.msra.mxu1 %v3293_v14  ;;  %v3406_v14 = vld [vmem:[#allocation11 + $0x248] ss:$12 sps:$4 sm:$0xff]  }
 0x19c   : > { %839 = vmatprep.subr.bf16.mxu1 %v3298_v15  ;;  %v1027_v15 = vlaneseq }
 0x19d   : > { %1491 = vmatpush1.bf16.msra.mxu0 %v3396_v10  ;;  %v3422_v10 = vld [vmem:[#allocation11 + $0x2a8] ss:$12 sps:$4 sm:$0xff]  }
 0x19e   : > { %1492 = vmatprep.subr.bf16.mxu0 %v3403_v12  ;;  %v3424_v12 = vld [vmem:[#allocation11 + $0x458] ss:$12 sps:$4 sm:$0xff]  }
 0x19f   : > { %840 = vmatpush1.bf16.msra.mxu1 %v3296_v16  ;;  %v4091_v16 = vshrl.u32 %v1027_v15, 7  ;;  %v3425_v15 = vld [vmem:[#allocation11 + $0x398] ss:$12 sps:$4 sm:$0xff]  }
 0x1a0   : > { %841 = vmatprep.subr.bf16.mxu1 %v3301_v17 }
 0x1a1   : > { %1493 = vmatpush1.bf16.msra.mxu0 %v3401_v13  ;;  %v4094_v17 = vsub.s32 0, %v4091_v16  ;;  %v3423_v13 = vld [vmem:[#allocation11 + $0x1e8] ss:$12 sps:$4 sm:$0xff]  }
 0x1a2   : > { %3016 = vmatprep.subr.bf16.mxu0 %v3406_v14  ;;  %v3426_v14 = vld [vmem:[#allocation11 + $0x2c0] ss:$12 sps:$4 sm:$0xff]  }
 0x1a3   : > { %842 = vmatpush1.bf16.msra.mxu1 %v3299_v18  ;;  %v1025_v18 = vld [vmem:[%s4197_s4] sm:$0x3] }
 0x1a4   : > { %843 = vmatprep.subr.bf16.mxu1 %v3304_v19  ;;  %v1033_v19 = vsub.s32 1, %v4091_v16 }
 0x1a7   : > { %844 = vmatpush1.bf16.msra.mxu1 %v3302_v20  ;;  %v1030_v20 = vrot.slane %v1025_v18, %v4094_v17 }
 0x1a8   : > { %845 = vmatprep.subr.bf16.mxu1 %v3307_v21  ;;  %v1034_v21 = vrot.slane %v1025_v18, %v1033_v19  ;;  %v3428_v18 = vld [vmem:[#allocation11 + $0x470] ss:$12 sps:$4 sm:$0xff]  }
 0x1ab   : > { %846 = vmatpush1.bf16.msra.mxu1 %v3305_v22 }
 0x1ac   : > { %847 = vmatprep.subr.bf16.mxu1 %v3310_v23 }
 0x1af   : > { %848 = vmatpush1.bf16.msra.mxu1 %v3308_v24 }
 0x1b0   : > { %849 = vmatprep.subr.bf16.mxu1 %v3313_v25 }
 0x1b3   : > { %850 = vmatpush1.bf16.msra.mxu1 %v3311_v26 }
 0x1b4   : > { %978 = vmatprep.subr.bf16.mxu1 %v3316_v27 }
 0x1b6   : > { %868 = vmatmul.mubr.bf16.vlgmr.msra.gmra.mrb[4].mxu1 %v595_v31 }
 0x1b7   : > { %979 = vmatpush1.bf16.msra.mxu1 %v3314_v30  ;;  %1010 = vmatprep.mubr.bf16.mxu1 %v3785_v28  ;;  %v3332_v28 = vld [vmem:[#allocation10 + $0x160] ss:$8 sps:$4 sm:$0xff]  }
 0x1b8   : > { %980 = vmatprep.subr.bf16.mxu1 %v3319_v32 }
 0x1bb   : > { %981 = vmatpush1.bf16.msra.mxu1 %v3317_v33 }
 0x1bc   : > { %982 = vmatprep.subr.bf16.mxu1 %v3322_v34 }
 0x1bf   : > { %983 = vmatpush1.bf16.msra.mxu1 %v3320_v35 }
 0x1c0   : > { %984 = vmatprep.subr.bf16.mxu1 %v3325_v36 }
 0x1c3   : > { %985 = vmatpush1.bf16.msra.mxu1 %v3323_v37 }
 0x1c4   : > { %986 = vmatprep.subr.bf16.mxu1 %v3328_v38 }
 0x1c7   : > { %987 = vmatpush1.bf16.msra.mxu1 %v3326_v39 }
 0x1c8   : > { %988 = vmatprep.subr.bf16.mxu1 %v3331_v40 }
 0x1cb   : > { %989 = vmatpush1.bf16.msra.mxu1 %v3329_v41 }
 0x1cc   : > { %990 = vmatprep.subr.bf16.mxu1 %v3334_v42 }
 0x1cf   : > { %991 = vmatpush1.bf16.msra.mxu1 %v3332_v28 }
 0x1d0   : > { %992 = vmatprep.subr.bf16.mxu1 %v3337_v43 }
 0x1d3   : > { %993 = vmatpush1.bf16.msra.mxu1 %v3335_v44  ;;  %v3400_v44 = vld [vmem:[#allocation11 + $0x308] ss:$12 sps:$4 sm:$0xff]  }
 0x1d4   : > { %3038 = vmatprep.subr.bf16.mxu1 %v3359_v45 }
 0x1d6   : > { %1011 = vmatmul.mubr.bf16.vlgmr.msra.gmra.mrb[4].mxu1 %v880_v49 }
 0x1d7   : > { %3039 = vmatpush3.bf16.msra.mxu1 %v3360_v48  ;;  %v3404_v48 = vld [vmem:[#allocation11 + $0x3e0] ss:$12 sps:$4 sm:$0xff]  }
 0x1d8   : > { %3040 = vmatprep.subr.bf16.mxu1 %v3364_v50 }
 0x1db   : > { %3041 = vmatpush3.bf16.msra.mxu1 %v3365_v51 }
 0x1dc   : > { %3042 = vmatprep.subr.bf16.mxu1 %v3369_v52 }
 0x1df   : > { %3043 = vmatpush3.bf16.msra.mxu1 %v3370_v53  ;;  %v3405_v53 = vld [vmem:[#allocation11 + $0x320] ss:$12 sps:$4 sm:$0xff]  }
 0x1e0   : > { %3044 = vmatprep.subr.bf16.mxu1 %v3374_v54 }
 0x1e3   : > { %3045 = vmatpush3.bf16.msra.mxu1 %v3375_v55 }
 0x1e4   : > { %3046 = vmatprep.subr.bf16.mxu1 %v3379_v58 }
 0x1e7   : > { %3047 = vmatpush3.bf16.msra.mxu1 %v3380_v59  ;;  %v3407_v59 = vld [vmem:[#allocation11 + $0x188] ss:$12 sps:$4 sm:$0xff]  }
 0x1e8   : > { %3048 = vmatprep.subr.bf16.mxu1 %v3384_v62  ;;  %v3409_v62 = vld [vmem:[#allocation11 + $0x338] ss:$12 sps:$4 sm:$0xff]  }
 0x1eb   : > { %3049 = vmatpush3.bf16.msra.mxu1 %v3385_v63  ;;  %v3412_v63 = vld [vmem:[#allocation11 + $0x410] ss:$12 sps:$4 sm:$0xff]  }
 0x1ec   : > { %3050 = vmatprep.subr.bf16.mxu1 %v3389_v3  ;;  %v3413_v3 = vld [vmem:[#allocation11 + $0x350] ss:$12 sps:$4 sm:$0xff]  }
 0x1ef   : > { %3051 = vmatpush3.bf16.msra.mxu1 %v3390_v4  ;;  %v3416_v4 = vld [vmem:[#allocation11 + $0x428] ss:$12 sps:$4 sm:$0xff]  }
 0x1f0   : > { %3052 = vmatprep.subr.bf16.mxu1 %v3394_v7  ;;  %v3417_v7 = vld [vmem:[#allocation11 + $0x368] ss:$12 sps:$4 sm:$0xff]  }
 0x1f3   : > { %3053 = vmatpush3.bf16.msra.mxu1 %v3395_v9  ;;  %v3419_v9 = vld [vmem:[#allocation11 + $0x1d0] ss:$12 sps:$4 sm:$0xff]  }
 0x1f4   : > { %3060 = vmatprep.subr.bf16.mxu1 %v3399_v11  ;;  %v3421_v11 = vld [vmem:[#allocation11 + $0x380] ss:$12 sps:$4 sm:$0xff]  }
 0x2a9   : > { %v1012_v22 = vpop.f32.mrb[4].mxu1 }
 0x2aa   : > { %v1037_v23 = vadd.f32 %v1030_v20, %v1012_v22  ;;  %v1014_v24 = vpop.f32.mrb[5].mxu1  ;;  %v3430_v22 = vld [vmem:[#allocation11 + $0x2d8] ss:$12 sps:$4 sm:$0xff]  }
 0x2ab   : > { %v1038_v25 = vadd.f32 %v1034_v21, %v1014_v24  ;;  %v1016_v26 = vpop.f32.mrb[6].mxu1 }
 0x2ac   : > { %v1041_v27 = vmax.f32 %v1037_v23, 0.0  ;;  %v1039_v29 = vadd.f32 %v1030_v20, %v1016_v26  ;;  %v1018_v30 = vpop.f32.mrb[7].mxu1  ;;  %v3427_v20 = vld [vmem:[#allocation11 + $0x200] ss:$12 sps:$4 sm:$0xff]   ;;  %v3429_v23 = vld [vmem:[#allocation11 + $0x3b0] ss:$12 sps:$4 sm:$0xff]  }
 0x2ad   : > { %v1042_v31 = vmax.f32 %v1038_v25, 0.0  ;;  %v1040_v32 = vadd.f32 %v1034_v21, %v1018_v30  ;;  %v3431_v26 = vld [vmem:[#allocation11 + $0x218] ss:$12 sps:$4 sm:$0xff]   ;;  %v3433_v30 = vld [vmem:[#allocation11 + $0x230] ss:$12 sps:$4 sm:$0xff]  }
 0x2ae   : > { %1045 = vst [vmem:[#allocation3] sm:$0xff] %v1041_v27  ;;  %v1043_v33 = vmax.f32 %v1039_v29, 0.0 }
 0x2af   : > { %1046 = vst [vmem:[#allocation3 + $0x8] sm:$0xff] %v1042_v31  ;;  %v1044_v34 = vmax.f32 %v1040_v32, 0.0  ;;  %v3434_v32 = vld [vmem:[#allocation11] ss:$12 sps:$4 sm:$0xff]  }
 0x2b0   : > { %1047 = vst [vmem:[#allocation3 + $0x10] sm:$0xf] %v1043_v33  ;;  %v3439_v33 = vld [vmem:[#allocation11 + $0x1c] ss:$12 sps:$4 sm:$0xff]  }
 0x2b1   : > { %1048 = vst [vmem:[#allocation3 + $0x18] sm:$0xf] %v1044_v34  ;;  %v3437_v34 = vld [vmem:[#allocation11 + $0x18] ss:$12 sps:$4 sm:$0xff]  }
 0x2b5   : > { %v1119_v36 = vld [vmem:[#allocation3] sm:$0xfe] }
 0x2b6   : > { %v1887_v35 = vld [vmem:[#allocation3 + $0x8] sm:$0xfc]  ;;  %v1886_v24 = vld [vmem:[#allocation3] sm:$0xfc] }
 0x2b7   : > { %v1051_v37 = vld [vmem:[#allocation3 + $0x10] sm:$0x3]  ;;  %v1120_v38 = vld [vmem:[#allocation3 + $0x8] sm:$0xfe] }
 0x2b8   : > { %v1121_v39 = vld [vmem:[#allocation3 + $0x10] sm:$0x7]  ;;  %v1052_v40 = vld [vmem:[#allocation3 + $0x18] sm:$0x3]  ;;  %v4105_v47 = vpack.c.bf16 %v1051_v37, %v1041_v27  ;;  %v3445_v37 = vld [vmem:[#allocation11 + $0x4c] ss:$12 sps:$4 sm:$0xff]  }
 0x2b9   : > { %v1889_v41 = vld [vmem:[#allocation3 + $0x18] sm:$0xf]  ;;  %v1123_v28 = vpack.c.bf16 %v1121_v39, %v1119_v36  ;;  %v4103_v43 = vpack.c.bf16 %v1052_v40, %v1042_v31  ;;  %v1888_v21 = vld [vmem:[#allocation3 + $0x10] sm:$0xf]  ;;  %v3446_v40 = vld [vmem:[#allocation11 + $0x60] ss:$12 sps:$4 sm:$0xff]  }
 0x2ba   : > { %v1122_v42 = vld [vmem:[#allocation3 + $0x18] sm:$0x7]  ;;  %v1891_v45 = vpack.c.bf16 %v1889_v41, %v1887_v35  ;;  %v1890_v25 = vpack.c.bf16 %v1888_v21, %v1886_v24  ;;  %v3442_v35 = vld [vmem:[#allocation11 + $0x34] ss:$12 sps:$4 sm:$0xff]   ;;  %v3451_v41 = vld [vmem:[#allocation11 + $0x7c] ss:$12 sps:$4 sm:$0xff]  }
 0x2bb   : > { %v1124_v46 = vpack.c.bf16 %v1122_v42, %v1120_v38  ;;  %v1193_v49 = vshll.u32 %v1123_v28, 16  ;;  %1877 = vmatprep.mubr.bf16.mxu1 %v4103_v43  ;;  %v1191_v56 = vshrl.u32 %v1123_v28, 16  ;;  %v3432_v27 = vld [vmem:[#allocation11 + $0x2f0] ss:$12 sps:$4 sm:$0xff]   ;;  %v3443_v38 = vld [vmem:[#allocation11 + $0x48] ss:$12 sps:$4 sm:$0xff]  }
 0x2bc   : > { %v4108_v50 = vrot.slane %v1891_v45, 1  ;;  %1878 = vmatmul.mubr.bf16.vlgmr.msra.gmra.mrb[8].mxu1 %v4105_v47  ;;  %v4115_v29 = vrot.slane %v1890_v25, 1  ;;  %v3436_v31 = vld [vmem:[#allocation11 + $0x4] ss:$12 sps:$4 sm:$0xff]   ;;  %v3454_v28 = vld [vmem:[#allocation11 + $0x94] ss:$12 sps:$4 sm:$0xff]  }
 0x2bd   : > { %v1200_v51 = vshll.u32 %v1124_v46, 16  ;;  %v1195_v52 = vrot.slane %v1193_v49, 1  ;;  %3061 = vmatpush3.bf16.msra.mxu1 %v3400_v44  ;;  %v1198_v54 = vshrl.u32 %v1124_v46, 16  ;;  %v3440_v36 = vld [vmem:[#allocation11 + $0x30] ss:$12 sps:$4 sm:$0xff]   ;;  %v3532_v21 = vld [vmem:[#allocation13 + $0x48] sm:$0xff]  }
 0x2be   : > { %2294 = vmatprep.mubr.bf16.mxu1 %v4108_v50  ;;  %3062 = vmatprep.subr.bf16.mxu1 %v3404_v48  ;;  %v3448_v39 = vld [vmem:[#allocation11 + $0x64] ss:$12 sps:$4 sm:$0xff]   ;;  %v3457_v44 = vld [vmem:[#allocation11 + $0xac] ss:$12 sps:$4 sm:$0xff]   ;;  %v3455_v45 = vld [vmem:[#allocation11 + $0xa8] ss:$12 sps:$4 sm:$0xff]  }
 0x2bf   : > { %v1202_v55 = vrot.slane %v1200_v51, 1  ;;  %v4112_v60 = vor.u32 %v1195_v52, %v1191_v56  ;;  %v3449_v42 = vld [vmem:[#allocation11 + $0x78] ss:$12 sps:$4 sm:$0xff]   ;;  %v3458_v48 = vld [vmem:[#allocation11 + $0xc0] ss:$12 sps:$4 sm:$0xff]   ;;  %v3534_v25 = vld [vmem:[#allocation13 + $0x50] sm:$0xff]  }
 0x2c0   : > { %v3460_v46 = vld [vmem:[#allocation11 + $0xc4] ss:$12 sps:$4 sm:$0xff]   ;;  %v3463_v49 = vld [vmem:[#allocation11 + $0xdc] ss:$12 sps:$4 sm:$0xff]   ;;  %v3466_v52 = vld [vmem:[#allocation11 + $0xf4] ss:$12 sps:$4 sm:$0xff]  }
 0x2c1   : > { %v1203_v58 = vor.u32 %v1202_v55, %v1198_v54  ;;  %3063 = vmatpush3.bf16.msra.mxu1 %v3405_v53  ;;  %v3461_v51 = vld [vmem:[#allocation11 + $0xd8] ss:$12 sps:$4 sm:$0xff]   ;;  %v3464_v53 = vld [vmem:[#allocation11 + $0xf0] ss:$12 sps:$4 sm:$0xff]   ;;  %v3467_v55 = vld [vmem:[#allocation11 + $0x108] ss:$12 sps:$4 sm:$0xff]  }
 0x2c2   : > { %3064 = vmatprep.subr.bf16.mxu1 %v3408_v57  ;;  %v3469_v54 = vld [vmem:[#allocation11 + $0x10c] ss:$12 sps:$4 sm:$0xff]   ;;  %v3472_v56 = vld [vmem:[#allocation11 + $0x124] ss:$12 sps:$4 sm:$0xff]  }
 0x2c3   : > { %1494 = vmatprep.mubr.bf16.mxu0 %v1203_v58  ;;  %v3470_v57 = vld [vmem:[#allocation11 + $0x120] ss:$12 sps:$4 sm:$0xff]  }
 0x2c4   : > { %1495 = vmatmul.mubr.bf16.vlgmr.msra.gmra.mrb[8].mxu0 %v4112_v60  ;;  %v3533_v24 = vld [vmem:[#allocation13 + $0x8] sm:$0xff]  }
 0x2c5   : > { %3017 = vmatpush3.bf16.msra.mxu0 %v3407_v59  ;;  %1537 = vmatprep.mubr.bf16.mxu0 %v1203_v58  ;;  %v3475_v58 = vld [vmem:[#allocation11 + $0x13c] ss:$12 sps:$4 sm:$0xff]   ;;  %v3473_v59 = vld [vmem:[#allocation11 + $0x138] ss:$12 sps:$4 sm:$0xff]  }
 0x2c6   : > { %3018 = vmatprep.subr.bf16.mxu0 %v3410_v61  ;;  %3065 = vmatpush3.bf16.msra.mxu1 %v3409_v62  ;;  %v3476_v61 = vld [vmem:[#allocation11 + $0x150] ss:$12 sps:$4 sm:$0xff]   ;;  %v3481_v62 = vld [vmem:[#allocation11 + $0x16c] ss:$12 sps:$4 sm:$0xff]  }
 0x2c7   : > { %3066 = vmatprep.subr.bf16.mxu1 %v3412_v63  ;;  %v3479_v63 = vld [vmem:[#allocation11 + $0x168] ss:$12 sps:$4 sm:$0xff]  }
 0x2c9   : > { %3019 = vmatpush3.bf16.msra.mxu0 %v3411_v1  ;;  %v3484_v1 = vld [vmem:[#allocation11 + $0x304] ss:$12 sps:$4 sm:$0xff]  }
 0x2ca   : > { %3020 = vmatprep.subr.bf16.mxu0 %v3414_v2  ;;  %3067 = vmatpush3.bf16.msra.mxu1 %v3413_v3  ;;  %v3482_v2 = vld [vmem:[#allocation11 + $0x300] ss:$12 sps:$4 sm:$0xff]   ;;  %v3487_v3 = vld [vmem:[#allocation11 + $0x31c] ss:$12 sps:$4 sm:$0xff]  }
 0x2cb   : > { %3068 = vmatprep.subr.bf16.mxu1 %v3416_v4  ;;  %v3485_v4 = vld [vmem:[#allocation11 + $0x318] ss:$12 sps:$4 sm:$0xff]  }
 0x2cd   : > { %3021 = vmatpush3.bf16.msra.mxu0 %v3415_v5  ;;  %v3490_v5 = vld [vmem:[#allocation11 + $0x334] ss:$12 sps:$4 sm:$0xff]  }
 0x2ce   : > { %3022 = vmatprep.subr.bf16.mxu0 %v3418_v6  ;;  %3069 = vmatpush3.bf16.msra.mxu1 %v3417_v7  ;;  %v3488_v6 = vld [vmem:[#allocation11 + $0x330] ss:$12 sps:$4 sm:$0xff]   ;;  %v3493_v7 = vld [vmem:[#allocation11 + $0x34c] ss:$12 sps:$4 sm:$0xff]  }
 0x2cf   : > { %3070 = vmatprep.subr.bf16.mxu1 %v3420_v8  ;;  %v3491_v8 = vld [vmem:[#allocation11 + $0x348] ss:$12 sps:$4 sm:$0xff]  }
 0x2d1   : > { %3023 = vmatpush3.bf16.msra.mxu0 %v3419_v9  ;;  %v3496_v9 = vld [vmem:[#allocation11 + $0x364] ss:$12 sps:$4 sm:$0xff]  }
 0x2d2   : > { %3024 = vmatprep.subr.bf16.mxu0 %v3422_v10  ;;  %3071 = vmatpush3.bf16.msra.mxu1 %v3421_v11  ;;  %v3494_v10 = vld [vmem:[#allocation11 + $0x360] ss:$12 sps:$4 sm:$0xff]   ;;  %v3499_v11 = vld [vmem:[#allocation11 + $0x37c] ss:$12 sps:$4 sm:$0xff]  }
 0x2d3   : > { %3072 = vmatprep.subr.bf16.mxu1 %v3424_v12  ;;  %v3502_v12 = vld [vmem:[#allocation11 + $0x394] ss:$12 sps:$4 sm:$0xff]  }
 0x2d5   : > { %3025 = vmatpush3.bf16.msra.mxu0 %v3423_v13  ;;  %v3505_v13 = vld [vmem:[#allocation11 + $0x3ac] ss:$12 sps:$4 sm:$0xff]  }
 0x2d6   : > { %3026 = vmatprep.subr.bf16.mxu0 %v3426_v14  ;;  %3073 = vmatpush3.bf16.msra.mxu1 %v3425_v15  ;;  %v3503_v14 = vld [vmem:[#allocation11 + $0x3a8] ss:$12 sps:$4 sm:$0xff]   ;;  %v3508_v15 = vld [vmem:[#allocation11 + $0x3c4] ss:$12 sps:$4 sm:$0xff]  }
 0x2d7   : > { %3074 = vmatprep.subr.bf16.mxu1 %v3428_v18  ;;  %v3530_v18 = vld [vmem:[#allocation13 + $0x40] sm:$0xff]  }
 0x2d9   : > { %3027 = vmatpush3.bf16.msra.mxu0 %v3427_v20  ;;  %v3531_v20 = vld [vmem:[#allocation13] sm:$0xff]  }
 0x2da   : > { %3028 = vmatprep.subr.bf16.mxu0 %v3430_v22  ;;  %3075 = vmatpush3.bf16.msra.mxu1 %v3429_v23  ;;  %v3506_v22 = vld [vmem:[#allocation11 + $0x3c0] ss:$12 sps:$4 sm:$0xff]   ;;  %v3511_v23 = vld [vmem:[#allocation11 + $0x3dc] ss:$12 sps:$4 sm:$0xff]  }
 0x2db   : > { %3082 = vmatprep.subr.bf16.mxu1 %v3530_v18 }
 0x2dd   : > { %3029 = vmatpush3.bf16.msra.mxu0 %v3431_v26  ;;  %2295 = vmatmul.mubr.bf16.vlgmr.msra.gmra.mrb[12].mxu1 %v4115_v29  ;;  %v3509_v26 = vld [vmem:[#allocation11 + $0x3d8] ss:$12 sps:$4 sm:$0xff]  }
 0x2de   : > { %3030 = vmatprep.subr.bf16.mxu0 %v3432_v27  ;;  %3083 = vmatpush3.bf16.msra.mxu1 %v3531_v20  ;;  %v3514_v27 = vld [vmem:[#allocation11 + $0x3f4] ss:$12 sps:$4 sm:$0xff]  }
 0x2df   : > { %3084 = vmatprep.subr.bf16.mxu1 %v3532_v21 }
 0x2e1   : > { %3031 = vmatpush3.bf16.msra.mxu0 %v3433_v30  ;;  %v3535_v30 = vld [vmem:[#allocation13 + $0x10] sm:$0xff]  }
 0x2e2   : > { %1802 = vmatprep.subr.bf16.mxu0 %v3436_v31  ;;  %3085 = vmatpush3.bf16.msra.mxu1 %v3533_v24  ;;  %v3536_v31 = vld [vmem:[#allocation13 + $0x58] sm:$0xff]  }
 0x2e3   : > { %3086 = vmatprep.subr.bf16.mxu1 %v3534_v25 }
 0x2e4   : > { %1538 = vmatmul.mubr.bf16.vlgmr.msra.gmra.mrb[12].mxu0 %v4112_v60  ;;  %v3478_v60 = vld [vmem:[#allocation11 + $0x154] ss:$12 sps:$4 sm:$0xff]  }
 0x2e5   : > { %1803 = vmatpush1.bf16.msra.mxu0 %v3434_v32  ;;  %1834 = vmatprep.mubr.bf16.mxu0 %v4103_v43  ;;  %v3452_v43 = vld [vmem:[#allocation11 + $0x90] ss:$12 sps:$4 sm:$0xff]  }
 0x2e6   : > { %1804 = vmatprep.subr.bf16.mxu0 %v3439_v33  ;;  %v3512_v32 = vld [vmem:[#allocation11 + $0x3f0] ss:$12 sps:$4 sm:$0xff]   ;;  %v3517_v33 = vld [vmem:[#allocation11 + $0x40c] ss:$12 sps:$4 sm:$0xff]   ;;  %3087 = vmatpush3.bf16.msra.mxu1 %v3535_v30 }
 0x2e7   : > { %3088 = vmatprep.subr.bf16.mxu1 %v3536_v31 }
 0x2e9   : > { %1805 = vmatpush1.bf16.msra.mxu0 %v3437_v34  ;;  %v3537_v34 = vld [vmem:[#allocation13 + $0x18] sm:$0xff]  }
 0x2ea   : > { %1806 = vmatprep.subr.bf16.mxu0 %v3442_v35  ;;  %v3515_v35 = vld [vmem:[#allocation11 + $0x408] ss:$12 sps:$4 sm:$0xff]   ;;  %3089 = vmatpush3.bf16.msra.mxu1 %v3537_v34 }
 0x2ed   : > { %1807 = vmatpush1.bf16.msra.mxu0 %v3440_v36  ;;  %v3520_v36 = vld [vmem:[#allocation11 + $0x424] ss:$12 sps:$4 sm:$0xff]  }
 0x2ee   : > { %1808 = vmatprep.subr.bf16.mxu0 %v3445_v37  ;;  %v3518_v37 = vld [vmem:[#allocation11 + $0x420] ss:$12 sps:$4 sm:$0xff]  }
 0x2f1   : > { %1809 = vmatpush1.bf16.msra.mxu0 %v3443_v38  ;;  %v3523_v38 = vld [vmem:[#allocation11 + $0x43c] ss:$12 sps:$4 sm:$0xff]  }
 0x2f2   : > { %1810 = vmatprep.subr.bf16.mxu0 %v3448_v39  ;;  %v3521_v39 = vld [vmem:[#allocation11 + $0x438] ss:$12 sps:$4 sm:$0xff]  }
 0x2f5   : > { %1811 = vmatpush1.bf16.msra.mxu0 %v3446_v40  ;;  %v3526_v40 = vld [vmem:[#allocation11 + $0x454] ss:$12 sps:$4 sm:$0xff]  }
 0x2f6   : > { %1812 = vmatprep.subr.bf16.mxu0 %v3451_v41  ;;  %v3524_v41 = vld [vmem:[#allocation11 + $0x450] ss:$12 sps:$4 sm:$0xff]  }
 0x2f9   : > { %1813 = vmatpush1.bf16.msra.mxu0 %v3449_v42  ;;  %v3529_v42 = vld [vmem:[#allocation11 + $0x46c] ss:$12 sps:$4 sm:$0xff]  }
 0x2fa   : > { %1814 = vmatprep.subr.bf16.mxu0 %v3454_v28  ;;  %v3527_v28 = vld [vmem:[#allocation11 + $0x468] ss:$12 sps:$4 sm:$0xff]  }
 0x2fd   : > { %1815 = vmatpush1.bf16.msra.mxu0 %v3452_v43 }
 0x2fe   : > { %1816 = vmatprep.subr.bf16.mxu0 %v3457_v44 }
 0x301   : > { %1817 = vmatpush1.bf16.msra.mxu0 %v3455_v45 }
 0x302   : > { %1818 = vmatprep.subr.bf16.mxu0 %v3460_v46 }
 0x305   : > { %1819 = vmatpush1.bf16.msra.mxu0 %v3458_v48 }
 0x306   : > { %1820 = vmatprep.subr.bf16.mxu0 %v3463_v49 }
 0x309   : > { %1821 = vmatpush1.bf16.msra.mxu0 %v3461_v51 }
 0x30a   : > { %1822 = vmatprep.subr.bf16.mxu0 %v3466_v52 }
 0x30d   : > { %1823 = vmatpush1.bf16.msra.mxu0 %v3464_v53 }
 0x30e   : > { %1824 = vmatprep.subr.bf16.mxu0 %v3469_v54 }
 0x311   : > { %1825 = vmatpush1.bf16.msra.mxu0 %v3467_v55 }
 0x312   : > { %1826 = vmatprep.subr.bf16.mxu0 %v3472_v56 }
 0x315   : > { %1827 = vmatpush1.bf16.msra.mxu0 %v3470_v57 }
 0x316   : > { %1828 = vmatprep.subr.bf16.mxu0 %v3475_v58  ;;  %v2321_v58 = vsub.s32 2, %v4091_v16 }
 0x319   : > { %1829 = vmatpush1.bf16.msra.mxu0 %v3473_v59  ;;  %v3538_v59 = vld [vmem:[#allocation13 + $0x60] sm:$0xff]  }
 0x31a   : > { %1830 = vmatprep.subr.bf16.mxu0 %v3478_v60  ;;  %3090 = vmatprep.subr.bf16.mxu1 %v3538_v59 }
 0x31d   : > { %1831 = vmatpush1.bf16.msra.mxu0 %v3476_v61  ;;  %v3539_v61 = vld [vmem:[#allocation13 + $0x20] sm:$0xff]  }
 0x31e   : > { %1832 = vmatprep.subr.bf16.mxu0 %v3481_v62  ;;  %3091 = vmatpush3.bf16.msra.mxu1 %v3539_v61 }
 0x321   : > { %1833 = vmatpush1.bf16.msra.mxu0 %v3479_v63 }
 0x322   : > { %2219 = vmatprep.subr.bf16.mxu0 %v3484_v1 }
 0x324   : > { %1835 = vmatmul.mubr.bf16.vlgmr.msra.gmra.mrb[8].mxu0 %v4105_v47  ;;  %v3497_v47 = vld [vmem:[#allocation11 + $0x378] ss:$12 sps:$4 sm:$0xff]  }
 0x325   : > { %2220 = vmatpush1.bf16.msra.mxu0 %v3482_v2  ;;  %2251 = vmatprep.mubr.bf16.mxu0 %v4108_v50  ;;  %v3500_v50 = vld [vmem:[#allocation11 + $0x390] ss:$12 sps:$4 sm:$0xff]  }
 0x326   : > { %2221 = vmatprep.subr.bf16.mxu0 %v3487_v3 }
 0x329   : > { %2222 = vmatpush1.bf16.msra.mxu0 %v3485_v4 }
 0x32a   : > { %2223 = vmatprep.subr.bf16.mxu0 %v3490_v5  ;;  %v3540_v5 = vld [vmem:[#allocation13 + $0x68] sm:$0xff]  }
 0x32b   : > { %3092 = vmatprep.subr.bf16.mxu1 %v3540_v5 }
 0x32d   : > { %2224 = vmatpush1.bf16.msra.mxu0 %v3488_v6  ;;  %v3541_v6 = vld [vmem:[#allocation13 + $0x28] sm:$0xff]  }
 0x32e   : > { %2225 = vmatprep.subr.bf16.mxu0 %v3493_v7  ;;  %3093 = vmatpush3.bf16.msra.mxu1 %v3541_v6 }
 0x331   : > { %2226 = vmatpush1.bf16.msra.mxu0 %v3491_v8 }
 0x332   : > { %2227 = vmatprep.subr.bf16.mxu0 %v3496_v9 }
 0x335   : > { %2228 = vmatpush1.bf16.msra.mxu0 %v3494_v10 }
 0x336   : > { %2229 = vmatprep.subr.bf16.mxu0 %v3499_v11  ;;  %v3542_v11 = vld [vmem:[#allocation13 + $0x70] sm:$0xff]  }
 0x337   : > { %3094 = vmatprep.subr.bf16.mxu1 %v3542_v11 }
 0x339   : > { %2230 = vmatpush1.bf16.msra.mxu0 %v3497_v47  ;;  %v3543_v47 = vld [vmem:[#allocation13 + $0x30] sm:$0xff]  }
 0x33a   : > { %2231 = vmatprep.subr.bf16.mxu0 %v3502_v12  ;;  %v3544_v12 = vld [vmem:[#allocation13 + $0x78] sm:$0xff]   ;;  %3095 = vmatpush3.bf16.msra.mxu1 %v3543_v47 }
 0x33b   : > { %3096 = vmatprep.subr.bf16.mxu1 %v3544_v12 }
 0x33d   : > { %2232 = vmatpush1.bf16.msra.mxu0 %v3500_v50 }
 0x33e   : > { %2233 = vmatprep.subr.bf16.mxu0 %v3505_v13 }
 0x341   : > { %2234 = vmatpush1.bf16.msra.mxu0 %v3503_v14  ;;  %v3545_v14 = vld [vmem:[#allocation13 + $0x38] sm:$0xff]  }
 0x342   : > { %2235 = vmatprep.subr.bf16.mxu0 %v3508_v15  ;;  %3097 = vmatpush3.bf16.msra.mxu1 %v3545_v14 }
 0x343   : > { %3131 = vmatprep.subr.bf16.mxu1 %v3783_v0 }
 0x345   : > { %2236 = vmatpush1.bf16.msra.mxu0 %v3506_v22 }
 0x346   : > { %2237 = vmatprep.subr.bf16.mxu0 %v3511_v23 }
 0x349   : > { %2238 = vmatpush1.bf16.msra.mxu0 %v3509_v26 }
 0x34a   : > { %2239 = vmatprep.subr.bf16.mxu0 %v3514_v27 }
 0x34d   : > { %2240 = vmatpush1.bf16.msra.mxu0 %v3512_v32 }
 0x34e   : > { %2241 = vmatprep.subr.bf16.mxu0 %v3517_v33 }
 0x351   : > { %2242 = vmatpush1.bf16.msra.mxu0 %v3515_v35 }
 0x352   : > { %2243 = vmatprep.subr.bf16.mxu0 %v3520_v36 }
 0x355   : > { %2244 = vmatpush1.bf16.msra.mxu0 %v3518_v37 }
 0x356   : > { %2245 = vmatprep.subr.bf16.mxu0 %v3523_v38  ;;  %v3546_v38 = vld [vmem:[#allocation13 + $0x80] sm:$0xff]  }
 0x359   : > { %2246 = vmatpush1.bf16.msra.mxu0 %v3521_v39  ;;  %v3548_v39 = vld [vmem:[#allocation13 + $0x90] sm:$0xff]  }
 0x35a   : > { %2247 = vmatprep.subr.bf16.mxu0 %v3526_v40  ;;  %v3549_v40 = vld [vmem:[#allocation13 + $0x98] sm:$0xff]  }
 0x35d   : > { %2248 = vmatpush1.bf16.msra.mxu0 %v3524_v41  ;;  %v3550_v41 = vld [vmem:[#allocation13 + $0xa0] sm:$0xff]  }
 0x35e   : > { %2249 = vmatprep.subr.bf16.mxu0 %v3529_v42  ;;  %v3551_v42 = vld [vmem:[#allocation13 + $0xa8] sm:$0xff]  }
 0x361   : > { %2250 = vmatpush1.bf16.msra.mxu0 %v3527_v28  ;;  %v3552_v28 = vld [vmem:[#allocation13 + $0xb0] sm:$0xff]  }
 0x364   : > { %2252 = vmatmul.mubr.bf16.vlgmr.msra.gmra.mrb[8].mxu0 %v4115_v29  ;;  %v2309_v29 = vld [vmem:[%s4199_s6] sm:$0x7] }
 0x365   : > { %v2322_v4 = vrot.slane %v2309_v29, %v2321_v58  ;;  %v2314_v18 = vrot.slane %v2309_v29, %v4094_v17  ;;  %v2318_v20 = vrot.slane %v2309_v29, %v1033_v19  ;;  %v3547_v19 = vld [vmem:[#allocation13 + $0x88] sm:$0xff]  }
 0x38f   : > { %v3054_v43 = vpop.f32.mrb[8].mxu1 }
 0x390   : > { %v3055_v44 = vpop.f32.mrb[9].mxu1 }
 0x391   : > { %v3056_v45 = vadd.f32 %v3055_v44, %v3054_v43  ;;  %v3057_v46 = vpop.f32.mrb[10].mxu1  ;;  %v3553_v43 = vld [vmem:[#allocation13 + $0xb8] sm:$0xff]  }
 0x392   : > { %v3058_v48 = vpop.f32.mrb[11].mxu1 }
 0x393   : > { %v3059_v49 = vadd.f32 %v3058_v48, %v3057_v46 }
 0x3b0   : > { %v3076_v51 = vpop.f32.mrb[12].mxu1 }
 0x3b1   : > { %v3077_v52 = vpop.f32.mrb[13].mxu1 }
 0x3b2   : > { %v3078_v53 = vadd.f32 %v3077_v52, %v3076_v51  ;;  %v3079_v54 = vpop.f32.mrb[14].mxu1 }
 0x3b3   : > { %v3080_v55 = vpop.f32.mrb[15].mxu1 }
 0x3b4   : > { %v3081_v56 = vadd.f32 %v3080_v55, %v3079_v54 }
 0x3b7   : > { %v3032_v57 = vpop.f32.mrb[12].mxu0 }
 0x3b8   : > { %v3033_v60 = vpop.f32.mrb[13].mxu0 }
 0x3b9   : > { %v3034_v62 = vadd.f32 %v3033_v60, %v3032_v57  ;;  %v3035_v63 = vpop.f32.mrb[14].mxu0 }
 0x3ba   : > { %v3036_v1 = vpop.f32.mrb[15].mxu0 }
 0x3bb   : > { %v1880_v2 = vadd.f32 %v3056_v45, %v3034_v62  ;;  %v3037_v3 = vadd.f32 %v3036_v1, %v3035_v63 }
 0x3bd   : > { %v2305_v7 = vadd.f32 %v3078_v53, %v1880_v2  ;;  %v1883_v8 = vadd.f32 %v3059_v49, %v3037_v3  ;;  %v2636_v2 = vld [vmem:[%s4201_s8] sm:$0x1] }
 0x3bf   : > { %v2308_v9 = vadd.f32 %v3081_v56, %v1883_v8  ;;  %v2328_v10 = vadd.f32 %v2322_v4, %v2305_v7 }
 0x3c1   : > { %v2331_v50 = vadd.f32 %v2322_v4, %v2308_v9  ;;  %v2334_v13 = vmax.f32 %v2328_v10, 0.0 }
 0x3c3   : > { %v2337_v15 = vmax.f32 %v2331_v50, 0.0 }
 0x3c5   : > { %2343 = vst [vmem:[#allocation4 + $0x28] sm:$0x3] %v2337_v15 }
 0x3cc   : > { %v2349_v44 = vld [vmem:[#allocation4 + $0x28] sm:$0x3] }
 0x3cd   : > { %v2352_v45 = vpack.c.bf16 %v2349_v44, %v2334_v13 }
 0x437   : > { %v2253_v21 = vpop.f32.mrb[8].mxu0 }
 0x438   : > { %v2326_v22 = vadd.f32 %v2314_v18, %v2253_v21  ;;  %v2255_v23 = vpop.f32.mrb[9].mxu0 }
 0x439   : > { %v2327_v24 = vadd.f32 %v2318_v20, %v2255_v23  ;;  %v2257_v25 = vpop.f32.mrb[10].mxu0 }
 0x43a   : > { %v2332_v26 = vmax.f32 %v2326_v22, 0.0  ;;  %v2329_v27 = vadd.f32 %v2314_v18, %v2257_v25  ;;  %v2259_v30 = vpop.f32.mrb[11].mxu0 }
 0x43b   : > { %v2333_v31 = vmax.f32 %v2327_v24, 0.0  ;;  %v2330_v32 = vadd.f32 %v2318_v20, %v2259_v30 }
 0x43c   : > { %v2335_v33 = vmax.f32 %v2329_v27, 0.0 }
 0x43d   : > { %v2336_v34 = vmax.f32 %v2330_v32, 0.0 }
 0x43e   : > { %2341 = vst [vmem:[#allocation4 + $0x18] sm:$0x3] %v2335_v33 }
 0x43f   : > { %2342 = vst [vmem:[#allocation4 + $0x20] sm:$0x3] %v2336_v34 }
 0x445   : > { %v2347_v35 = vld [vmem:[#allocation4 + $0x18] sm:$0x3] }
 0x446   : > { %v2348_v36 = vld [vmem:[#allocation4 + $0x20] sm:$0x3]  ;;  %v2350_v16 = vpack.c.bf16 %v2347_v35, %v2332_v26 }
 0x447   : > { %v2351_v37 = vpack.c.bf16 %v2348_v36, %v2333_v31 }
 0x449   : > { %2577 = vmatprep.mubr.bf16.mxu1 %v2351_v37 }
 0x44a   : > { %2578 = vmatmul.mubr.bf16.vlgmr.msra.gmra.mrb[16].mxu1 %v2350_v16 }
 0x44b   : > { %3132 = vmatpush3.bf16.msra.mxu1 %v3546_v38  ;;  %3147 = vmatprep.mubr.msk.bf16.mxu1 %vm3784_vm0, %v3783_v0 }
 0x44c   : > { %3133 = vmatprep.subr.bf16.mxu1 %v3783_v0 }
 0x44f   : > { %3134 = vmatpush3.bf16.msra.mxu1 %v3547_v19 }
 0x450   : > { %3135 = vmatprep.subr.bf16.mxu1 %v3783_v0 }
 0x453   : > { %3136 = vmatpush3.bf16.msra.mxu1 %v3548_v39 }
 0x454   : > { %3137 = vmatprep.subr.bf16.mxu1 %v3783_v0 }
 0x457   : > { %3138 = vmatpush3.bf16.msra.mxu1 %v3549_v40 }
 0x458   : > { %3139 = vmatprep.subr.bf16.mxu1 %v3783_v0 }
 0x45b   : > { %3140 = vmatpush3.bf16.msra.mxu1 %v3550_v41 }
 0x45c   : > { %3141 = vmatprep.subr.bf16.mxu1 %v3783_v0 }
 0x45f   : > { %3142 = vmatpush3.bf16.msra.mxu1 %v3551_v42 }
 0x460   : > { %3143 = vmatprep.subr.bf16.mxu1 %v3783_v0 }
 0x463   : > { %3144 = vmatpush3.bf16.msra.mxu1 %v3552_v28 }
 0x464   : > { %3145 = vmatprep.subr.bf16.mxu1 %v3783_v0 }
 0x467   : > { %3146 = vmatpush3.bf16.msra.mxu1 %v3553_v43 }
 0x46a   : > { %3148 = vmatmul.mubr.bf16.vlgmr.msra.gmra.mrb[20].mxu1 %v2352_v45 }
 0x51d   : > { %v3098_v46 = vpop.f32.mrb[16].mxu1 }
 0x51e   : > { %v3099_v48 = vpop.f32.mrb[17].mxu1 }
 0x51f   : > { %v3100_v49 = vadd.f32 %v3099_v48, %v3098_v46  ;;  %v3101_v51 = vpop.f32.mrb[18].mxu1 }
 0x520   : > { %v3102_v52 = vpop.f32.mrb[19].mxu1 }
 0x521   : > { %v3103_v53 = vadd.f32 %v3102_v52, %v3101_v51 }
 0x53d   : > { %v2620_v54 = vpop.f32.mrb[20].mxu1 }
 0x53e   : > { %v2621_v55 = vadd.f32 %v3100_v49, %v2620_v54  ;;  %v3149_v56 = vpop.f32.mrb[21].mxu1 }
 0x53f   : > { %v2623_v57 = vpop.f32.mrb[22].mxu1 }
 0x540   : > { %v2624_v58 = vadd.f32 %v3103_v53, %v2623_v57  ;;  %v3150_v59 = vpop.f32.mrb[23].mxu1 }
 0x542   : > { %v2628_v0 = vsel %vm2627_vm2, %v2624_v58, 0.0 }
 0x543   : > { %v2629_v60 = vadd.f32 %v2628_v0, %v2621_v55 }
 0x545   : > { %v2630_v29 = vrot.slane %v2629_v60, 4 }
 0x547   : > { %v2631_v61 = vadd.f32 %v2630_v29, %v2629_v60 }
 0x549   : > { %v2632_v62 = vrot.slane %v2631_v61, 2 }
 0x54b   : > { %v2633_v63 = vadd.f32 %v2632_v62, %v2631_v61 }
 0x54d   : > { %v2634_v1 = vrot.slane %v2633_v63, 1 }
 0x54f   : > { %v2635_v3 = vadd.f32 %v2634_v1, %v2633_v63 }
 0x551   : > { %v2637_v4 = vadd.f32 %v2636_v2, %v2635_v3 }
 0x553   : > { %v2641_v5 = vrot.slane %v2637_v4, %v4094_v17 }
 0x555   : > { %2642 = vst [vmem:[%s408_s27] sm:$0xff] %v2641_v5 }
 0x556   : > { %3709 = shalt.err (!%p3706_p13)
}
 0x557   : > { %s3710_s26 = scalar_lea.hbm %s4149_s15, 128  ;;  %s3714_s20 = scalar_lea.hbm %s4202_s9, 256 }
 0x558   : > { %p3711_p9 = scmp.ne.s32.totalorder %s4149_s15, %s3710_s26  ;;  %p3715_p11 = scmp.lt.u32.totalorder %s4149_s15, %s4202_s9 }
 0x559   : > { %p3716_p8 = scmp.lt.u32.totalorder %s3714_s20, %s3710_s26  ;;  %p3718_p3 = scmp.lt.u32.totalorder %s3710_s26, %s4149_s15 }
 0x55a   : > { %p3712_p0 = pnand %p3711_p9, %p4002_p10 }
 0x55b   : > { %p3717_p6 = por %p3716_p8, %p3715_p11 }
 0x55c   : > { %p3713_p4 = pneg %p3712_p0 }
 0x55d   : > { %p3719_p5 = por %p3718_p3, %p3717_p6 }
 0x55f   : > { %p3720_p7 = pnand %p3719_p5, %p3713_p4 }
 0x561   : > { %3723 = shalt.err (!%p3720_p7)
}
 0x562   : > { %3185 = dma.vmem_to_hbm [thread:$0]  (%p4002_p10), %s4151_s22, 128, %s4149_s15, %s2644_s17  }
 0x563 PF: > { %s4230_s27 = sld [smem:[#allocation19_spill]]  ;;  %s4231_s23 = sld [smem:[#allocation20_spill]] }
 0x564   : > { %p4233_p1 = scmp.ge.s32.totalorder %s3770_s12, 2 }
 0x569   : > { %s2669_s18 = sand.u32 1, %s4230_s27   ;;  %p4232_p12 = scmp.ne.s32.totalorder %s4231_s23, 0 }
 0x56a   : > { %s2670_s21 = scalar_lea.sflag [#allocation7], %s2669_s18 }
 0x56b   : > { %p3205_p2 = pnand %p4233_p1, %p4232_p12 }
 0x56d   : > { %3753 = dma.done.wait (!%p3205_p2), %s2670_s21, 128  }
 0x56e   : > { %3755 = vsyncadd (!%p3205_p2), %s2670_s21, 4294967168  ;;  %p24_p13 = scmp.ge.s32.totalorder %s3992_s28, 4   ;;  %s4234_s30 = smov %s3762_s10 }
 0x56f   : > { %s4235_s10 = smov %s3766_s11  ;;  %s4236_s11 = smov %s4008_s14 }
 0x570   : > { %s4237_s12 = smov %s3992_s28  ;;  %26 = sbr.rel (!%p24_p13) target bundleno = 9 (0x9), region = 123 }
 0x577   :  { %2675 = vsyncpa [#allocation6], 1 }
 0x578   :  { %2677 = vsyncpa [#allocation6 + $0x1], 1 }
 0x579   :  { %2678 = vsyncpa [#allocation9], 1 }
 0x57a   :  { %2679 = vsyncpa [#allocation12], 1 }
 0x57b   :  { %2680 = vsyncpa [#allocation7], 1 }
 0x57c   :  { %2682 = vsyncpa [#allocation7 + $0x1], 1 }

</bundles_post_ra>
